<compile_context>
chip_gen: v7x
topology: tpu7x:2x2x1
jax: 0.10.0
libtpu: 0.0.40
codegen_flags: <defaults>
</compile_context>

<pallas_src>
import math
from functools import partial

import numpy as np
import jax
import jax.numpy as jnp
from jax.experimental import pallas as pl
from jax.experimental.pallas import tpu as pltpu

ACT_DTYPE = jnp.bfloat16          # HBM-side activation dtype (f32 accumulation)
VMEM_LIMIT = 32 * 1024 * 1024     # safe on v5e/v6e (128 MiB) and v7x (64 MiB)


# ------------------------------ small helpers -------------------------------

def _round_up(x, m):
    return (x + m - 1) // m * m


def _pick_tile(d, maxt, align):
    """Largest tile (multiple of `align`, <= maxt) that divides round_up(d, align)."""
    d_al = _round_up(d, align)
    if d_al <= maxt:
        return d_al
    for t in range(maxt, align - 1, -align):
        if d_al % t == 0:
            return t
    return maxt


def _pad2d(a, R, C):
    r, c = a.shape
    if r == R and c == C:
        return a
    return jnp.pad(a, ((0, R - r), (0, C - c)))


# ----------------------------- Pallas: matmul --------------------------------

def _matmul_kernel(x_ref, w_ref, o_ref, acc_ref):
    @pl.when(pl.program_id(2) == 0)
    def _():
        acc_ref[...] = jnp.zeros(acc_ref.shape, acc_ref.dtype)

    acc_ref[...] += jnp.dot(x_ref[...], w_ref[...],
                            preferred_element_type=jnp.float32)

    @pl.when(pl.program_id(2) == pl.num_programs(2) - 1)
    def _():
        o_ref[...] = acc_ref[...].astype(o_ref.dtype)


def _matmul_bias_kernel(x_ref, w_ref, b_ref, o_ref, acc_ref):
    @pl.when(pl.program_id(2) == 0)
    def _():
        acc_ref[...] = jnp.zeros(acc_ref.shape, acc_ref.dtype)

    acc_ref[...] += jnp.dot(x_ref[...], w_ref[...],
                            preferred_element_type=jnp.float32)

    @pl.when(pl.program_id(2) == pl.num_programs(2) - 1)
    def _():
        o_ref[...] = (acc_ref[...] + b_ref[...]).astype(o_ref.dtype)


def linear_pallas(x2d, w, b=None, out_dtype=ACT_DTYPE):
    """y = x @ w (+ b); bf16 operands, f32 accumulation, tiled grid."""
    M, K = x2d.shape
    K2, N = w.shape
    assert K == K2

    tm = _pick_tile(M, 256, 8)
    tn = _pick_tile(N, 256, 128)
    tk = _pick_tile(K, 512, 128)
    Mp, Np, Kp = _round_up(M, tm), _round_up(N, tn), _round_up(K, tk)

    xp = _pad2d(x2d.astype(ACT_DTYPE), Mp, Kp)
    wp = _pad2d(w.astype(ACT_DTYPE), Kp, Np)

    grid = (Mp // tm, Np // tn, Kp // tk)
    cp = pltpu.CompilerParams(
        dimension_semantics=("parallel", "parallel", "arbitrary"),
        vmem_limit_bytes=VMEM_LIMIT)

    if b is None:
        out = pl.pallas_call(
            _matmul_kernel,
            out_shape=jax.ShapeDtypeStruct((Mp, Np), out_dtype),
            grid=grid,
            in_specs=[pl.BlockSpec((tm, tk), lambda i, j, k: (i, k)),
                      pl.BlockSpec((tk, tn), lambda i, j, k: (k, j))],
            out_specs=pl.BlockSpec((tm, tn), lambda i, j, k: (i, j)),
            scratch_shapes=[pltpu.VMEM((tm, tn), jnp.float32)],
            compiler_params=cp,
        )(xp, wp)
    else:
        bp = _pad2d(b.reshape(1, N).astype(jnp.float32), 1, Np)
        out = pl.pallas_call(
            _matmul_bias_kernel,
            out_shape=jax.ShapeDtypeStruct((Mp, Np), out_dtype),
            grid=grid,
            in_specs=[pl.BlockSpec((tm, tk), lambda i, j, k: (i, k)),
                      pl.BlockSpec((tk, tn), lambda i, j, k: (k, j)),
                      pl.BlockSpec((1, tn), lambda i, j, k: (0, j))],
            out_specs=pl.BlockSpec((tm, tn), lambda i, j, k: (i, j)),
            scratch_shapes=[pltpu.VMEM((tm, tn), jnp.float32)],
            compiler_params=cp,
        )(xp, wp, bp)

    return out[:M, :N]


# ---------------------------- Pallas: LayerNorm -------------------------------

def _layernorm_kernel(x_ref, g_ref, b_ref, o_ref, *, eps):
    x = x_ref[...].astype(jnp.float32)
    mu = jnp.mean(x, axis=-1, keepdims=True)
    xc = x - mu
    var = jnp.mean(xc * xc, axis=-1, keepdims=True)
    y = xc * jax.lax.rsqrt(var + eps)
    o_ref[...] = (y * g_ref[...] + b_ref[...]).astype(o_ref.dtype)


def layernorm_pallas(x2d, g, b, eps=1e-5, out_dtype=ACT_DTYPE):
    """Row-tiled LayerNorm over the last dim; x2d: (M, C)."""
    M, C = x2d.shape
    tm = _pick_tile(M, 512, 8)
    Mp = _round_up(M, tm)
    xp = jnp.pad(x2d, ((0, Mp - M), (0, 0)))
    g2 = g.reshape(1, C).astype(jnp.float32)
    b2 = b.reshape(1, C).astype(jnp.float32)
    out = pl.pallas_call(
        partial(_layernorm_kernel, eps=eps),
        out_shape=jax.ShapeDtypeStruct((Mp, C), out_dtype),
        grid=(Mp // tm,),
        in_specs=[pl.BlockSpec((tm, C), lambda i: (i, 0)),
                  pl.BlockSpec((1, C), lambda i: (0, 0)),
                  pl.BlockSpec((1, C), lambda i: (0, 0))],
        out_specs=pl.BlockSpec((tm, C), lambda i: (i, 0)),
        compiler_params=pltpu.CompilerParams(
            dimension_semantics=("parallel",),
            vmem_limit_bytes=VMEM_LIMIT),
    )(xp, g2, b2)
    return out[:M]


# ------------------------ Pallas: flash attention -----------------------------

def _flash_attn_kernel(q_ref, k_ref, v_ref, o_ref, m_sc, l_sc, acc_sc,
                       *, scale, kv_len, tkv):
    ki = pl.program_id(2)

    @pl.when(ki == 0)
    def _():
        m_sc[...] = jnp.full(m_sc.shape, -jnp.inf, m_sc.dtype)
        l_sc[...] = jnp.zeros(l_sc.shape, l_sc.dtype)
        acc_sc[...] = jnp.zeros(acc_sc.shape, acc_sc.dtype)

    # scores = (q @ k^T) * scale, contracting on head_dim (no explicit k.T copy)
    s = jax.lax.dot_general(q_ref[0], k_ref[0],
                            (((1,), (1,)), ((), ())),
                            preferred_element_type=jnp.float32) * scale
    # mask key positions that are sequence padding
    col = jax.lax.broadcasted_iota(jnp.int32, s.shape, 1) + ki * tkv
    s = jnp.where(col < kv_len, s, -jnp.inf)

    m_prev = m_sc[...]
    m_new = jnp.maximum(m_prev, jnp.max(s, axis=-1, keepdims=True))
    alpha = jnp.exp(m_prev - m_new)
    p = jnp.exp(s - m_new)
    l_sc[...] = alpha * l_sc[...] + jnp.sum(p, axis=-1, keepdims=True)
    acc_sc[...] = alpha * acc_sc[...] + jnp.dot(
        p.astype(v_ref.dtype), v_ref[0], preferred_element_type=jnp.float32)
    m_sc[...] = m_new

    @pl.when(ki == pl.num_programs(2) - 1)
    def _():
        o_ref[0] = (acc_sc[...] *
                    pl.reciprocal(l_sc[...], approx=True)).astype(o_ref.dtype)


def attention_pallas(q, k, v, scale):
    """softmax((q*scale) @ k^T) @ v per (batch*head) via online softmax.

    q, k, v: (BH, N, Dh). Sequence and head_dim are zero-padded to TPU-friendly
    tiles (padded keys masked to -inf; padded Dh columns stay zero)."""
    BH, N, Dh = q.shape
    Dhp = _round_up(Dh, 128)            # lane-dense head dim
    tile = _pick_tile(N, 128, 8)
    Np = _round_up(N, tile)

    def pad3(a):
        return jnp.pad(a.astype(ACT_DTYPE),
                       ((0, 0), (0, Np - N), (0, Dhp - Dh)))

    qp, kp, vp = pad3(q), pad3(k), pad3(v)
    grid = (BH, Np // tile, Np // tile)

    out = pl.pallas_call(
        partial(_flash_attn_kernel, scale=scale, kv_len=N, tkv=tile),
        out_shape=jax.ShapeDtypeStruct((BH, Np, Dhp), ACT_DTYPE),
        grid=grid,
        in_specs=[pl.BlockSpec((1, tile, Dhp), lambda b, qi, ki: (b, qi, 0)),
                  pl.BlockSpec((1, tile, Dhp), lambda b, qi, ki: (b, ki, 0)),
                  pl.BlockSpec((1, tile, Dhp), lambda b, qi, ki: (b, ki, 0))],
        out_specs=pl.BlockSpec((1, tile, Dhp), lambda b, qi, ki: (b, qi, 0)),
        scratch_shapes=[pltpu.VMEM((tile, 1), jnp.float32),
                        pltpu.VMEM((tile, 1), jnp.float32),
                        pltpu.VMEM((tile, Dhp), jnp.float32)],
        compiler_params=pltpu.CompilerParams(
            dimension_semantics=("parallel", "parallel", "arbitrary"),
            vmem_limit_bytes=VMEM_LIMIT),
    )(qp, kp, vp)
    return out[:, :N, :Dh]


# --------------------------- model building blocks ---------------------------

def get_sinusoid_encoding_table(n_position, d_hid):
    pos = np.arange(n_position, dtype=np.float64)[:, None]
    hid = np.arange(d_hid, dtype=np.float64)[None, :]
    angle = pos / np.power(10000.0, 2.0 * (hid // 2) / d_hid)
    table = np.zeros((n_position, d_hid), dtype=np.float64)
    table[:, 0::2] = np.sin(angle[:, 0::2])
    table[:, 1::2] = np.cos(angle[:, 1::2])
    return jnp.asarray(table[None], dtype=jnp.float32)   # (1, N, D)


def block_forward(p, x, num_heads):
    """Pre-norm transformer block (no layer-scale, no drop-path)."""
    B, N, C = x.shape
    head_dim = C // num_heads
    scale = head_dim ** -0.5

    # --- attention branch ---
    h = layernorm_pallas(x.reshape(-1, C), p['ln1_g'], p['ln1_b']).reshape(B, N, C)
    qkv = linear_pallas(h.reshape(-1, C), p['qkv_w'])                 # no bias
    # TODO(synk): index q/k/v straight out of a (B,N,3,H,Dh) qkv tensor via
    # BlockSpec index_map to avoid this XLA-side transpose materialization.
    qkv = qkv.reshape(B, N, 3, num_heads, head_dim).transpose(2, 0, 3, 1, 4)
    q = qkv[0].reshape(B * num_heads, N, head_dim)
    k = qkv[1].reshape(B * num_heads, N, head_dim)
    v = qkv[2].reshape(B * num_heads, N, head_dim)
    o = attention_pallas(q, k, v, scale)                              # (BH, N, Dh)
    o = o.reshape(B, num_heads, N, head_dim).transpose(0, 2, 1, 3).reshape(B, N, C)
    o = linear_pallas(o.reshape(-1, C), p['proj_w'], p['proj_b']).reshape(B, N, C)
    x = x + o

    # --- MLP branch ---
    h = layernorm_pallas(x.reshape(-1, C), p['ln2_g'], p['ln2_b']).reshape(B, N, C)
    h1 = linear_pallas(h.reshape(-1, C), p['fc1_w'], p['fc1_b'])
    # TODO(synk): exact-erf GELU kept in XLA (erf lowering in Mosaic not
    # guaranteed); fuse tanh-GELU into the fc1 matmul epilogue if tolerance allows.
    h1 = jax.nn.gelu(h1.astype(jnp.float32), approximate=False).astype(ACT_DTYPE)
    h2 = linear_pallas(h1, p['fc2_w'], p['fc2_b']).reshape(B, N, C)
    x = x + h2
    return x


def patchify(x, tt, P):
    """NCTHW video -> (B, N, C*tt*P*P) with Conv3d-compatible flatten order."""
    B, C, T, H, W = x.shape
    x = x.reshape(B, C, T // tt, tt, H // P, P, W // P, P)
    x = x.transpose(0, 2, 4, 6, 1, 3, 5, 7)          # B, T', H', W', C, tt, P, P
    return x.reshape(B, (T // tt) * (H // P) * (W // P), C * tt * P * P)


def pretrain_vit_forward(params, cfg, x, mask, num_vis, num_mask):
    """Full PretrainVisionTransformer.forward -> (decoder_out, logits)."""
    B = x.shape[0]
    P, tt = cfg['patch_size'], cfg['tubelet_size']
    E, Cd = cfg['enc_dim'], cfg['dec_dim']

    # ---------------- Encoder ----------------
    patches = patchify(x, tt, P)                                       # (B, N, K)
    _, N, K = patches.shape
    tok = linear_pallas(patches.reshape(-1, K),
                        params['patch_w'], params['patch_b']).reshape(B, N, E)
    tok = tok + params['enc_pos'][:, :N, :].astype(tok.dtype)

    mask_i = mask.astype(jnp.int32)
    vis_idx = jnp.argsort(mask_i, axis=1, stable=True)[:, :num_vis]    # ~mask (visible)
    msk_idx = jnp.argsort(1 - mask_i, axis=1, stable=True)[:, :num_mask]

    x_vis = jnp.take_along_axis(tok, vis_idx[:, :, None], axis=1)      # (B, Nv, E)

    for bp in params['enc_blocks']:
        x_vis = block_forward(bp, x_vis, cfg['enc_heads'])
    x_vis = layernorm_pallas(x_vis.reshape(-1, E),
                             params['enc_norm_g'], params['enc_norm_b']
                             ).reshape(B, num_vis, E)
    # encoder head is Identity (encoder_num_classes == 0)

    # ---------------- Action head ----------------
    pooled = jnp.mean(x_vis.astype(jnp.float32), axis=1)               # (B, E)
    pooled = layernorm_pallas(pooled, params['fc_norm_g'], params['fc_norm_b'])
    # fc_dropout is identity in eval mode
    logits = linear_pallas(pooled, params['head_action_w'],
                           params['head_action_b'], out_dtype=jnp.float32)

    # ---------------- Decoder input assembly ----------------
    x_vis_d = linear_pallas(x_vis.reshape(-1, E),
                            params['enc2dec_w']).reshape(B, num_vis, Cd)
    dec_pos = jnp.broadcast_to(params['dec_pos'], (B, N, Cd)).astype(ACT_DTYPE)
    pos_vis = jnp.take_along_axis(dec_pos, vis_idx[:, :, None], axis=1)
    pos_msk = jnp.take_along_axis(dec_pos, msk_idx[:, :, None], axis=1)
    x_full = jnp.concatenate(
        [x_vis_d + pos_vis,
         params['mask_token'].astype(ACT_DTYPE) + pos_msk], axis=1)    # (B, N, Cd)

    # ---------------- Decoder ----------------
    h = x_full
    for bp in params['dec_blocks']:
        h = block_forward(bp, h, cfg['dec_heads'])
    Ntot = h.shape[1]
    if num_mask > 0:
        h = h[:, Ntot - num_mask:, :]
    hn = layernorm_pallas(h.reshape(-1, Cd),
                          params['dec_norm_g'], params['dec_norm_b'])
    out = linear_pallas(hn, params['dec_head_w'], params['dec_head_b'],
                        out_dtype=jnp.float32)
    out = out.reshape(B, -1, cfg['dec_num_classes'])
    return out, logits


# ------------------------------ parameter init -------------------------------

def xavier_uniform(key, shape):
    fan_in, fan_out = shape
    limit = math.sqrt(6.0 / (fan_in + fan_out))
    return jax.random.uniform(key, shape, jnp.float32, -limit, limit)


def init_block(key, dim, mlp_ratio):
    ks = jax.random.split(key, 4)
    hid = int(dim * mlp_ratio)
    return {
        'ln1_g': jnp.ones((dim,), jnp.float32), 'ln1_b': jnp.zeros((dim,), jnp.float32),
        'qkv_w': xavier_uniform(ks[0], (dim, 3 * dim)),                 # qkv_bias=False
        'proj_w': xavier_uniform(ks[1], (dim, dim)),
        'proj_b': jnp.zeros((dim,), jnp.float32),
        'ln2_g': jnp.ones((dim,), jnp.float32), 'ln2_b': jnp.zeros((dim,), jnp.float32),
        'fc1_w': xavier_uniform(ks[2], (dim, hid)),
        'fc1_b': jnp.zeros((hid,), jnp.float32),
        'fc2_w': xavier_uniform(ks[3], (hid, dim)),
        'fc2_b': jnp.zeros((dim,), jnp.float32),
    }


def init_params(key, cfg):
    k = jax.random.split(key, 16)
    P, tt, C_in = cfg['patch_size'], cfg['tubelet_size'], cfg['in_chans']
    E, Cd = cfg['enc_dim'], cfg['dec_dim']
    K_patch = C_in * tt * P * P
    n_patches = cfg['num_patches']

    enc_keys = jax.random.split(k[0], cfg['enc_depth'])
    dec_keys = jax.random.split(k[1], cfg['dec_depth'])
    params = {
        'patch_w': xavier_uniform(k[2], (K_patch, E)),
        'patch_b': jnp.zeros((E,), jnp.float32),
        'enc_pos': get_sinusoid_encoding_table(n_patches, E),
        'enc_blocks': [init_block(enc_keys[i], E, cfg['mlp_ratio'])
                       for i in range(cfg['enc_depth'])],
        'enc_norm_g': jnp.ones((E,), jnp.float32),
        'enc_norm_b': jnp.zeros((E,), jnp.float32),
        'fc_norm_g': jnp.ones((E,), jnp.float32),
        'fc_norm_b': jnp.zeros((E,), jnp.float32),
        'head_action_w': xavier_uniform(k[3], (E, cfg['num_classes_action'])),
        'head_action_b': jnp.zeros((cfg['num_classes_action'],), jnp.float32),
        'enc2dec_w': xavier_uniform(k[4], (E, Cd)),                     # no bias
        'mask_token': 0.02 * jax.random.normal(k[5], (1, 1, Cd), jnp.float32),
        'dec_pos': get_sinusoid_encoding_table(n_patches, Cd),
        'dec_blocks': [init_block(dec_keys[i], Cd, cfg['mlp_ratio'])
                       for i in range(cfg['dec_depth'])],
        'dec_norm_g': jnp.ones((Cd,), jnp.float32),
        'dec_norm_b': jnp.zeros((Cd,), jnp.float32),
        'dec_head_w': xavier_uniform(k[6], (Cd, cfg['dec_num_classes'])),
        'dec_head_b': jnp.zeros((cfg['dec_num_classes'],), jnp.float32),
    }
    return params


# ------------------------------------ main -----------------------------------

if __name__ == "__main__":
    # Small but faithful configuration.
    cfg = {
        'img_size': 16, 'patch_size': 8, 'in_chans': 3, 'tubelet_size': 2,
        'frames': 4,
        'enc_dim': 32, 'enc_depth': 2, 'enc_heads': 2,
        'dec_dim': 16, 'dec_depth': 1, 'dec_heads': 2,
        'mlp_ratio': 4.0,
        'num_classes_action': 8,
    }
    # decoder_num_classes must equal out_chans * tubelet * patch_size**2
    cfg['dec_num_classes'] = cfg['in_chans'] * cfg['tubelet_size'] * cfg['patch_size'] ** 2
    cfg['num_patches'] = ((cfg['frames'] // cfg['tubelet_size'])
                          * (cfg['img_size'] // cfg['patch_size']) ** 2)   # 2*2*2 = 8

    B = 2
    key = jax.random.PRNGKey(0)
    kx, kp = jax.random.split(key)

    # layout: x is NCTHW (B, C, T, H, W) — same as the PyTorch Conv3d input.
    x = jax.random.normal(kx, (B, cfg['in_chans'], cfg['frames'],
                               cfg['img_size'], cfg['img_size']), jnp.float32)

    # Deterministic boolean mask (True = masked), equal count per batch row.
    mask_np = np.zeros((B, cfg['num_patches']), dtype=bool)
    mask_np[0, [1, 3, 5, 7]] = True
    mask_np[1, [0, 2, 4, 6]] = True
    mask = jnp.asarray(mask_np)
    num_mask = int(mask_np[0].sum())
    num_vis = cfg['num_patches'] - num_mask

    params = init_params(kp, cfg)

    fwd = jax.jit(lambda p_, x_, m_: pretrain_vit_forward(
        p_, cfg, x_, m_, num_vis, num_mask))

    dec_out, logits = fwd(params, x, mask)
    jax.block_until_ready(dec_out)
    jax.block_until_ready(logits)

    assert dec_out.shape == (B, num_mask, cfg['dec_num_classes'])
    assert logits.shape == (B, cfg['num_classes_action'])
    assert bool(jnp.all(jnp.isfinite(dec_out)))
    assert bool(jnp.all(jnp.isfinite(logits)))
    print("KERNEL_OK")
</pallas_src>

<mosaic_0001>
module attributes {stable_mosaic.version = 11 : i64} {
  func.func @_matmul_bias_kernel(%arg0: i32, %arg1: i32, %arg2: i32, %arg3: memref<16x384xbf16, #tpu.memory_space<vmem>>, %arg4: memref<384x128xbf16, #tpu.memory_space<vmem>>, %arg5: memref<1x128xf32, #tpu.memory_space<vmem>>, %arg6: memref<16x128xbf16, #tpu.memory_space<vmem>>, %arg7: memref<16x128xf32, #tpu.memory_space<vmem>>) attributes {dimension_semantics = [#tpu.dimension_semantics<parallel>, #tpu.dimension_semantics<parallel>, #tpu.dimension_semantics<arbitrary>], iteration_bounds = array<i64: 1, 1, 1>, scalar_prefetch = 0 : i64, scratch_operands = 1 : i64, tpu.core_type = #tpu.core_type<tc>, window_params = [{transform_indices = @transform_0, window_bounds = array<i64: 16, 384>}, {transform_indices = @transform_1, window_bounds = array<i64: 384, 128>}, {transform_indices = @transform_2, window_bounds = array<i64: 1, 128>}, {transform_indices = @transform_3, window_bounds = array<i64: 16, 128>}]} {
    %c0_i32 = arith.constant 0 : i32
    %0 = arith.cmpi eq, %arg2, %c0_i32 : i32
    %1 = arith.extui %0 : i1 to i32
    %c0_i32_0 = arith.constant 0 : i32
    %2 = arith.cmpi ne, %1, %c0_i32_0 : i32
    scf.if %2 {
      %cst_10 = arith.constant 0.000000e+00 : f32
      %12 = vector.broadcast %cst_10 : f32 to vector<16x128xf32>
      %c0_11 = arith.constant 0 : index
      %c0_12 = arith.constant 0 : index
      %13 = vector.load %arg7[%c0_11, %c0_12] : memref<16x128xf32, #tpu.memory_space<vmem>>, vector<16x128xf32>
      tpu.vector_store %arg7[%c0_11, %c0_12], %12 {strides = array<i32>} : memref<16x128xf32, #tpu.memory_space<vmem>>, vector<16x128xf32>,
    } else {
    }
    %c0 = arith.constant 0 : index
    %c0_1 = arith.constant 0 : index
    %3 = vector.load %arg7[%c0, %c0_1] : memref<16x128xf32, #tpu.memory_space<vmem>>, vector<16x128xf32>
    %c0_2 = arith.constant 0 : index
    %c0_3 = arith.constant 0 : index
    %4 = vector.load %arg3[%c0_2, %c0_3] : memref<16x384xbf16, #tpu.memory_space<vmem>>, vector<16x384xbf16>
    %c0_4 = arith.constant 0 : index
    %c0_5 = arith.constant 0 : index
    %5 = vector.load %arg4[%c0_4, %c0_5] : memref<384x128xbf16, #tpu.memory_space<vmem>>, vector<384x128xbf16>
    %cst = arith.constant dense<0.000000e+00> : vector<16x128xf32>
    %6 = tpu.matmul %4, %5, %cst {dimension_numbers = #tpu.dot_dimension_numbers<[1], [0], [0], [1], [0, 0, 1, 1], [], []>} : vector<16x384xbf16>, vector<384x128xbf16>, vector<16x128xf32> -> vector<16x128xf32>
    %7 = arith.addf %3, %6 : vector<16x128xf32>
    %c0_6 = arith.constant 0 : index
    %c0_7 = arith.constant 0 : index
    %8 = vector.load %arg7[%c0_6, %c0_7] : memref<16x128xf32, #tpu.memory_space<vmem>>, vector<16x128xf32>
    tpu.vector_store %arg7[%c0_6, %c0_7], %7 {strides = array<i32>} : memref<16x128xf32, #tpu.memory_space<vmem>>, vector<16x128xf32>,
    %c0_i32_8 = arith.constant 0 : i32
    %9 = arith.cmpi eq, %arg2, %c0_i32_8 : i32
    %10 = arith.extui %9 : i1 to i32
    %c0_i32_9 = arith.constant 0 : i32
    %11 = arith.cmpi ne, %10, %c0_i32_9 : i32
    scf.if %11 {
      %c0_10 = arith.constant 0 : index
      %c0_11 = arith.constant 0 : index
      %12 = vector.load %arg7[%c0_10, %c0_11] : memref<16x128xf32, #tpu.memory_space<vmem>>, vector<16x128xf32>
      %c0_12 = arith.constant 0 : index
      %c0_13 = arith.constant 0 : index
      %13 = vector.load %arg5[%c0_12, %c0_13] : memref<1x128xf32, #tpu.memory_space<vmem>>, vector<1x128xf32>
      %14 = vector.broadcast %13 : vector<1x128xf32> to vector<16x128xf32>
      %15 = arith.addf %12, %14 : vector<16x128xf32>
      %16 = arith.truncf %15 : vector<16x128xf32> to vector<16x128xbf16>
      %c0_14 = arith.constant 0 : index
      %c0_15 = arith.constant 0 : index
      %17 = vector.load %arg6[%c0_14, %c0_15] : memref<16x128xbf16, #tpu.memory_space<vmem>>, vector<16x128xbf16>
      tpu.vector_store %arg6[%c0_14, %c0_15], %16 {strides = array<i32>} : memref<16x128xbf16, #tpu.memory_space<vmem>>, vector<16x128xbf16>,
    } else {
    }
    return
  }
  func.func @transform_0(%arg0: i32, %arg1: i32, %arg2: i32) -> (i32, i32) {
    %c0_i32 = arith.constant 0 : i32
    return %arg0, %arg2 : i32, i32
  }
  func.func @transform_1(%arg0: i32, %arg1: i32, %arg2: i32) -> (i32, i32) {
    %c0_i32 = arith.constant 0 : i32
    return %arg2, %arg1 : i32, i32
  }
  func.func @transform_2(%arg0: i32, %arg1: i32, %arg2: i32) -> (i32, i32) {
    %c0_i32 = arith.constant 0 : i32
    %c0_i32_0 = arith.constant 0 : i32
    return %c0_i32, %arg1 : i32, i32
  }
  func.func @transform_3(%arg0: i32, %arg1: i32, %arg2: i32) -> (i32, i32) {
    %c0_i32 = arith.constant 0 : i32
    return %arg0, %arg1 : i32, i32
  }
}

module attributes {stable_mosaic.version = 11 : i64} {
  func.func @_matmul_kernel(%arg0: i32, %arg1: i32, %arg2: i32, %arg3: memref<8x128xbf16, #tpu.memory_space<vmem>>, %arg4: memref<128x128xbf16, #tpu.memory_space<vmem>>, %arg5: memref<8x128xbf16, #tpu.memory_space<vmem>>, %arg6: memref<8x128xf32, #tpu.memory_space<vmem>>) attributes {dimension_semantics = [#tpu.dimension_semantics<parallel>, #tpu.dimension_semantics<parallel>, #tpu.dimension_semantics<arbitrary>], iteration_bounds = array<i64: 1, 1, 1>, scalar_prefetch = 0 : i64, scratch_operands = 1 : i64, tpu.core_type = #tpu.core_type<tc>, window_params = [{transform_indices = @transform_0, window_bounds = array<i64: 8, 128>}, {transform_indices = @transform_1, window_bounds = array<i64: 128, 128>}, {transform_indices = @transform_2, window_bounds = array<i64: 8, 128>}]} {
    %c0_i32 = arith.constant 0 : i32
    %0 = arith.cmpi eq, %arg2, %c0_i32 : i32
    %1 = arith.extui %0 : i1 to i32
    %c0_i32_0 = arith.constant 0 : i32
    %2 = arith.cmpi ne, %1, %c0_i32_0 : i32
    scf.if %2 {
      %cst_10 = arith.constant 0.000000e+00 : f32
      %12 = vector.broadcast %cst_10 : f32 to vector<8x128xf32>
      %c0_11 = arith.constant 0 : index
      %c0_12 = arith.constant 0 : index
      %13 = vector.load %arg6[%c0_11, %c0_12] : memref<8x128xf32, #tpu.memory_space<vmem>>, vector<8x128xf32>
      tpu.vector_store %arg6[%c0_11, %c0_12], %12 {strides = array<i32>} : memref<8x128xf32, #tpu.memory_space<vmem>>, vector<8x128xf32>,
    } else {
    }
    %c0 = arith.constant 0 : index
    %c0_1 = arith.constant 0 : index
    %3 = vector.load %arg6[%c0, %c0_1] : memref<8x128xf32, #tpu.memory_space<vmem>>, vector<8x128xf32>
    %c0_2 = arith.constant 0 : index
    %c0_3 = arith.constant 0 : index
    %4 = vector.load %arg3[%c0_2, %c0_3] : memref<8x128xbf16, #tpu.memory_space<vmem>>, vector<8x128xbf16>
    %c0_4 = arith.constant 0 : index
    %c0_5 = arith.constant 0 : index
    %5 = vector.load %arg4[%c0_4, %c0_5] : memref<128x128xbf16, #tpu.memory_space<vmem>>, vector<128x128xbf16>
    %cst = arith.constant dense<0.000000e+00> : vector<8x128xf32>
    %6 = tpu.matmul %4, %5, %cst {dimension_numbers = #tpu.dot_dimension_numbers<[1], [0], [0], [1], [0, 0, 1, 1], [], []>} : vector<8x128xbf16>, vector<128x128xbf16>, vector<8x128xf32> -> vector<8x128xf32>
    %7 = arith.addf %3, %6 : vector<8x128xf32>
    %c0_6 = arith.constant 0 : index
    %c0_7 = arith.constant 0 : index
    %8 = vector.load %arg6[%c0_6, %c0_7] : memref<8x128xf32, #tpu.memory_space<vmem>>, vector<8x128xf32>
    tpu.vector_store %arg6[%c0_6, %c0_7], %7 {strides = array<i32>} : memref<8x128xf32, #tpu.memory_space<vmem>>, vector<8x128xf32>,
    %c0_i32_8 = arith.constant 0 : i32
    %9 = arith.cmpi eq, %arg2, %c0_i32_8 : i32
    %10 = arith.extui %9 : i1 to i32
    %c0_i32_9 = arith.constant 0 : i32
    %11 = arith.cmpi ne, %10, %c0_i32_9 : i32
    scf.if %11 {
      %c0_10 = arith.constant 0 : index
      %c0_11 = arith.constant 0 : index
      %12 = vector.load %arg6[%c0_10, %c0_11] : memref<8x128xf32, #tpu.memory_space<vmem>>, vector<8x128xf32>
      %13 = arith.truncf %12 : vector<8x128xf32> to vector<8x128xbf16>
      %c0_12 = arith.constant 0 : index
      %c0_13 = arith.constant 0 : index
      %14 = vector.load %arg5[%c0_12, %c0_13] : memref<8x128xbf16, #tpu.memory_space<vmem>>, vector<8x128xbf16>
      tpu.vector_store %arg5[%c0_12, %c0_13], %13 {strides = array<i32>} : memref<8x128xbf16, #tpu.memory_space<vmem>>, vector<8x128xbf16>,
    } else {
    }
    return
  }
  func.func @transform_0(%arg0: i32, %arg1: i32, %arg2: i32) -> (i32, i32) {
    %c0_i32 = arith.constant 0 : i32
    return %arg0, %arg2 : i32, i32
  }
  func.func @transform_1(%arg0: i32, %arg1: i32, %arg2: i32) -> (i32, i32) {
    %c0_i32 = arith.constant 0 : i32
    return %arg2, %arg1 : i32, i32
  }
  func.func @transform_2(%arg0: i32, %arg1: i32, %arg2: i32) -> (i32, i32) {
    %c0_i32 = arith.constant 0 : i32
    return %arg0, %arg1 : i32, i32
  }
}

module attributes {stable_mosaic.version = 11 : i64} {
  func.func @_layernorm_kernel(%arg0: i32, %arg1: memref<8x32xbf16, #tpu.memory_space<vmem>>, %arg2: memref<1x32xf32, #tpu.memory_space<vmem>>, %arg3: memref<1x32xf32, #tpu.memory_space<vmem>>, %arg4: memref<8x32xbf16, #tpu.memory_space<vmem>>) attributes {dimension_semantics = [#tpu.dimension_semantics<parallel>], iteration_bounds = array<i64: 1>, scalar_prefetch = 0 : i64, scratch_operands = 0 : i64, tpu.core_type = #tpu.core_type<tc>, window_params = [{transform_indices = @transform_0, window_bounds = array<i64: 8, 32>}, {pipeline_mode = #tpu.pipeline_mode<synchronous>, transform_indices = @transform_1, window_bounds = array<i64: 1, 32>}, {pipeline_mode = #tpu.pipeline_mode<synchronous>, transform_indices = @transform_2, window_bounds = array<i64: 1, 32>}, {transform_indices = @transform_3, window_bounds = array<i64: 8, 32>}]} {
    %c0 = arith.constant 0 : index
    %c0_0 = arith.constant 0 : index
    %0 = vector.load %arg1[%c0, %c0_0] : memref<8x32xbf16, #tpu.memory_space<vmem>>, vector<8x32xbf16>
    %1 = arith.extf %0 : vector<8x32xbf16> to vector<8x32xf32>
    %cst = arith.constant dense<0.000000e+00> : vector<8xf32>
    %2 = vector.multi_reduction <add>, %1, %cst [1] : vector<8x32xf32> to vector<8xf32>
    %3 = vector.shape_cast %2 : vector<8xf32> to vector<8x1xf32>
    %cst_1 = arith.constant 3.200000e+01 : f32
    %4 = vector.broadcast %cst_1 : f32 to vector<8x1xf32>
    %5 = arith.divf %3, %4 : vector<8x1xf32>
    %6 = vector.broadcast %5 : vector<8x1xf32> to vector<8x32xf32>
    %7 = arith.subf %1, %6 : vector<8x32xf32>
    %8 = arith.mulf %7, %7 : vector<8x32xf32>
    %cst_2 = arith.constant dense<0.000000e+00> : vector<8xf32>
    %9 = vector.multi_reduction <add>, %8, %cst_2 [1] : vector<8x32xf32> to vector<8xf32>
    %10 = vector.shape_cast %9 : vector<8xf32> to vector<8x1xf32>
    %cst_3 = arith.constant 3.200000e+01 : f32
    %11 = vector.broadcast %cst_3 : f32 to vector<8x1xf32>
    %12 = arith.divf %10, %11 : vector<8x1xf32>
    %cst_4 = arith.constant 9.99999974E-6 : f32
    %13 = vector.broadcast %cst_4 : f32 to vector<8x1xf32>
    %14 = arith.addf %12, %13 : vector<8x1xf32>
    %15 = math.rsqrt %14 : vector<8x1xf32>
    %16 = vector.broadcast %15 : vector<8x1xf32> to vector<8x32xf32>
    %17 = arith.mulf %7, %16 : vector<8x32xf32>
    %c0_5 = arith.constant 0 : index
    %c0_6 = arith.constant 0 : index
    %18 = vector.load %arg2[%c0_5, %c0_6] : memref<1x32xf32, #tpu.memory_space<vmem>>, vector<1x32xf32>
    %19 = vector.broadcast %18 : vector<1x32xf32> to vector<8x32xf32>
    %20 = arith.mulf %17, %19 : vector<8x32xf32>
    %c0_7 = arith.constant 0 : index
    %c0_8 = arith.constant 0 : index
    %21 = vector.load %arg3[%c0_7, %c0_8] : memref<1x32xf32, #tpu.memory_space<vmem>>, vector<1x32xf32>
    %22 = vector.broadcast %21 : vector<1x32xf32> to vector<8x32xf32>
    %23 = arith.addf %20, %22 : vector<8x32xf32>
    %24 = arith.truncf %23 : vector<8x32xf32> to vector<8x32xbf16>
    %c0_9 = arith.constant 0 : index
    %c0_10 = arith.constant 0 : index
    %25 = vector.load %arg4[%c0_9, %c0_10] : memref<8x32xbf16, #tpu.memory_space<vmem>>, vector<8x32xbf16>
    tpu.vector_store %arg4[%c0_9, %c0_10], %24 {strides = array<i32>} : memref<8x32xbf16, #tpu.memory_space<vmem>>, vector<8x32xbf16>,
    return
  }
  func.func @transform_0(%arg0: i32) -> (i32, i32) {
    %c0_i32 = arith.constant 0 : i32
    %c0_i32_0 = arith.constant 0 : i32
    return %arg0, %c0_i32 : i32, i32
  }
  func.func @transform_1(%arg0: i32) -> (i32, i32) {
    %c0_i32 = arith.constant 0 : i32
    %c0_i32_0 = arith.constant 0 : i32
    %c0_i32_1 = arith.constant 0 : i32
    return %c0_i32, %c0_i32_0 : i32, i32
  }
  func.func @transform_2(%arg0: i32) -> (i32, i32) {
    %c0_i32 = arith.constant 0 : i32
    %c0_i32_0 = arith.constant 0 : i32
    %c0_i32_1 = arith.constant 0 : i32
    return %c0_i32, %c0_i32_0 : i32, i32
  }
  func.func @transform_3(%arg0: i32) -> (i32, i32) {
    %c0_i32 = arith.constant 0 : i32
    %c0_i32_0 = arith.constant 0 : i32
    return %arg0, %c0_i32 : i32, i32
  }
}

module attributes {stable_mosaic.version = 11 : i64} {
  func.func @_flash_attn_kernel(%arg0: i32, %arg1: i32, %arg2: i32, %arg3: memref<1x8x128xbf16, #tpu.memory_space<vmem>>, %arg4: memref<1x8x128xbf16, #tpu.memory_space<vmem>>, %arg5: memref<1x8x128xbf16, #tpu.memory_space<vmem>>, %arg6: memref<1x8x128xbf16, #tpu.memory_space<vmem>>, %arg7: memref<8x1xf32, #tpu.memory_space<vmem>>, %arg8: memref<8x1xf32, #tpu.memory_space<vmem>>, %arg9: memref<8x128xf32, #tpu.memory_space<vmem>>) attributes {dimension_semantics = [#tpu.dimension_semantics<parallel>, #tpu.dimension_semantics<parallel>, #tpu.dimension_semantics<arbitrary>], iteration_bounds = array<i64: 4, 1, 1>, scalar_prefetch = 0 : i64, scratch_operands = 3 : i64, tpu.core_type = #tpu.core_type<tc>, window_params = [{transform_indices = @transform_0, window_bounds = array<i64: 1, 8, 128>}, {transform_indices = @transform_1, window_bounds = array<i64: 1, 8, 128>}, {transform_indices = @transform_2, window_bounds = array<i64: 1, 8, 128>}, {transform_indices = @transform_3, window_bounds = array<i64: 1, 8, 128>}]} {
    %c0_i32 = arith.constant 0 : i32
    %0 = arith.cmpi eq, %arg2, %c0_i32 : i32
    %1 = arith.extui %0 : i1 to i32
    %c0_i32_0 = arith.constant 0 : i32
    %2 = arith.cmpi ne, %1, %c0_i32_0 : i32
    scf.if %2 {
      %cst_28 = arith.constant 0xFF800000 : f32
      %46 = vector.broadcast %cst_28 : f32 to vector<8x1xf32>
      %c0_29 = arith.constant 0 : index
      %c0_30 = arith.constant 0 : index
      %47 = vector.load %arg7[%c0_29, %c0_30] : memref<8x1xf32, #tpu.memory_space<vmem>>, vector<8x1xf32>
      tpu.vector_store %arg7[%c0_29, %c0_30], %46 {strides = array<i32>} : memref<8x1xf32, #tpu.memory_space<vmem>>, vector<8x1xf32>,
      %cst_31 = arith.constant 0.000000e+00 : f32
      %48 = vector.broadcast %cst_31 : f32 to vector<8x1xf32>
      %c0_32 = arith.constant 0 : index
      %c0_33 = arith.constant 0 : index
      %49 = vector.load %arg8[%c0_32, %c0_33] : memref<8x1xf32, #tpu.memory_space<vmem>>, vector<8x1xf32>
      tpu.vector_store %arg8[%c0_32, %c0_33], %48 {strides = array<i32>} : memref<8x1xf32, #tpu.memory_space<vmem>>, vector<8x1xf32>,
      %cst_34 = arith.constant 0.000000e+00 : f32
      %50 = vector.broadcast %cst_34 : f32 to vector<8x128xf32>
      %c0_35 = arith.constant 0 : index
      %c0_36 = arith.constant 0 : index
      %51 = vector.load %arg9[%c0_35, %c0_36] : memref<8x128xf32, #tpu.memory_space<vmem>>, vector<8x128xf32>
      tpu.vector_store %arg9[%c0_35, %c0_36], %50 {strides = array<i32>} : memref<8x128xf32, #tpu.memory_space<vmem>>, vector<8x128xf32>,
    } else {
    }
    %c0 = arith.constant 0 : index
    %c0_1 = arith.constant 0 : index
    %c0_2 = arith.constant 0 : index
    %3 = vector.load %arg3[%c0, %c0_1, %c0_2] : memref<1x8x128xbf16, #tpu.memory_space<vmem>>, vector<1x8x128xbf16>
    %4 = vector.shape_cast %3 : vector<1x8x128xbf16> to vector<8x128xbf16>
    %c0_3 = arith.constant 0 : index
    %c0_4 = arith.constant 0 : index
    %c0_5 = arith.constant 0 : index
    %5 = vector.load %arg4[%c0_3, %c0_4, %c0_5] : memref<1x8x128xbf16, #tpu.memory_space<vmem>>, vector<1x8x128xbf16>
    %6 = vector.shape_cast %5 : vector<1x8x128xbf16> to vector<8x128xbf16>
    %cst = arith.constant dense<0.000000e+00> : vector<8x8xf32>
    %7 = tpu.matmul %4, %6, %cst {dimension_numbers = #tpu.dot_dimension_numbers<[1], [1], [0], [0], [0, 0, 1, 0], [], []>} : vector<8x128xbf16>, vector<8x128xbf16>, vector<8x8xf32> -> vector<8x8xf32>
    %cst_6 = arith.constant 2.500000e-01 : f32
    %8 = vector.broadcast %cst_6 : f32 to vector<8x8xf32>
    %9 = arith.mulf %7, %8 : vector<8x8xf32>
    %10 = tpu.iota {dimensions = array<i32: 1>} : vector<8x8xi32>
    %c8_i32 = arith.constant 8 : i32
    %11 = arith.muli %arg2, %c8_i32 : i32
    %12 = vector.broadcast %11 : i32 to vector<8x8xi32>
    %13 = arith.addi %10, %12 : vector<8x8xi32>
    %c4_i32 = arith.constant 4 : i32
    %14 = vector.broadcast %c4_i32 : i32 to vector<8x8xi32>
    %15 = arith.cmpi slt, %13, %14 : vector<8x8xi32>
    %cst_7 = arith.constant 0xFF800000 : f32
    %16 = vector.broadcast %cst_7 : f32 to vector<8x8xf32>
    %17 = arith.select %15, %9, %16 : vector<8x8xi1>, vector<8x8xf32>
    %c0_8 = arith.constant 0 : index
    %c0_9 = arith.constant 0 : index
    %18 = vector.load %arg7[%c0_8, %c0_9] : memref<8x1xf32, #tpu.memory_space<vmem>>, vector<8x1xf32>
    %cst_10 = arith.constant dense<0xFF800000> : vector<8xf32>
    %19 = vector.multi_reduction <maximumf>, %17, %cst_10 [1] : vector<8x8xf32> to vector<8xf32>
    %20 = vector.shape_cast %19 : vector<8xf32> to vector<8x1xf32>
    %21 = arith.maximumf %18, %20 : vector<8x1xf32>
    %22 = arith.subf %18, %21 : vector<8x1xf32>
    %23 = math.exp %22 : vector<8x1xf32>
    %24 = vector.broadcast %21 : vector<8x1xf32> to vector<8x8xf32>
    %25 = arith.subf %17, %24 : vector<8x8xf32>
    %26 = math.exp %25 : vector<8x8xf32>
    %c0_11 = arith.constant 0 : index
    %c0_12 = arith.constant 0 : index
    %27 = vector.load %arg8[%c0_11, %c0_12] : memref<8x1xf32, #tpu.memory_space<vmem>>, vector<8x1xf32>
    %28 = arith.mulf %23, %27 : vector<8x1xf32>
    %cst_13 = arith.constant dense<0.000000e+00> : vector<8xf32>
    %29 = vector.multi_reduction <add>, %26, %cst_13 [1] : vector<8x8xf32> to vector<8xf32>
    %30 = vector.shape_cast %29 : vector<8xf32> to vector<8x1xf32>
    %31 = arith.addf %28, %30 : vector<8x1xf32>
    %c0_14 = arith.constant 0 : index
    %c0_15 = arith.constant 0 : index
    %32 = vector.load %arg8[%c0_14, %c0_15] : memref<8x1xf32, #tpu.memory_space<vmem>>, vector<8x1xf32>
    tpu.vector_store %arg8[%c0_14, %c0_15], %31 {strides = array<i32>} : memref<8x1xf32, #tpu.memory_space<vmem>>, vector<8x1xf32>,
    %c0_16 = arith.constant 0 : index
    %c0_17 = arith.constant 0 : index
    %33 = vector.load %arg9[%c0_16, %c0_17] : memref<8x128xf32, #tpu.memory_space<vmem>>, vector<8x128xf32>
    %34 = vector.broadcast %23 : vector<8x1xf32> to vector<8x128xf32>
    %35 = arith.mulf %34, %33 : vector<8x128xf32>
    %36 = arith.truncf %26 : vector<8x8xf32> to vector<8x8xbf16>
    %c0_18 = arith.constant 0 : index
    %c0_19 = arith.constant 0 : index
    %c0_20 = arith.constant 0 : index
    %37 = vector.load %arg5[%c0_18, %c0_19, %c0_20] : memref<1x8x128xbf16, #tpu.memory_space<vmem>>, vector<1x8x128xbf16>
    %38 = vector.shape_cast %37 : vector<1x8x128xbf16> to vector<8x128xbf16>
    %cst_21 = arith.constant dense<0.000000e+00> : vector<8x128xf32>
    %39 = tpu.matmul %36, %38, %cst_21 {dimension_numbers = #tpu.dot_dimension_numbers<[1], [0], [0], [1], [0, 0, 1, 1], [], []>} : vector<8x8xbf16>, vector<8x128xbf16>, vector<8x128xf32> -> vector<8x128xf32>
    %40 = arith.addf %35, %39 : vector<8x128xf32>
    %c0_22 = arith.constant 0 : index
    %c0_23 = arith.constant 0 : index
    %41 = vector.load %arg9[%c0_22, %c0_23] : memref<8x128xf32, #tpu.memory_space<vmem>>, vector<8x128xf32>
    tpu.vector_store %arg9[%c0_22, %c0_23], %40 {strides = array<i32>} : memref<8x128xf32, #tpu.memory_space<vmem>>, vector<8x128xf32>,
    %c0_24 = arith.constant 0 : index
    %c0_25 = arith.constant 0 : index
    %42 = vector.load %arg7[%c0_24, %c0_25] : memref<8x1xf32, #tpu.memory_space<vmem>>, vector<8x1xf32>
    tpu.vector_store %arg7[%c0_24, %c0_25], %21 {strides = array<i32>} : memref<8x1xf32, #tpu.memory_space<vmem>>, vector<8x1xf32>,
    %c0_i32_26 = arith.constant 0 : i32
    %43 = arith.cmpi eq, %arg2, %c0_i32_26 : i32
    %44 = arith.extui %43 : i1 to i32
    %c0_i32_27 = arith.constant 0 : i32
    %45 = arith.cmpi ne, %44, %c0_i32_27 : i32
    scf.if %45 {
      %c0_28 = arith.constant 0 : index
      %c0_29 = arith.constant 0 : index
      %46 = vector.load %arg9[%c0_28, %c0_29] : memref<8x128xf32, #tpu.memory_space<vmem>>, vector<8x128xf32>
      %c0_30 = arith.constant 0 : index
      %c0_31 = arith.constant 0 : index
      %47 = vector.load %arg8[%c0_30, %c0_31] : memref<8x1xf32, #tpu.memory_space<vmem>>, vector<8x1xf32>
      %48 = tpu.reciprocal %47 {approx = true} : vector<8x1xf32> -> vector<8x1xf32>
      %49 = vector.broadcast %48 : vector<8x1xf32> to vector<8x128xf32>
      %50 = arith.mulf %46, %49 : vector<8x128xf32>
      %51 = arith.truncf %50 : vector<8x128xf32> to vector<8x128xbf16>
      %c0_32 = arith.constant 0 : index
      %c0_33 = arith.constant 0 : index
      %c0_34 = arith.constant 0 : index
      %52 = vector.load %arg6[%c0_32, %c0_33, %c0_34] : memref<1x8x128xbf16, #tpu.memory_space<vmem>>, vector<1x8x128xbf16>
      %53 = vector.shape_cast %52 : vector<1x8x128xbf16> to vector<8x128xbf16>
      %54 = vector.shape_cast %51 : vector<8x128xbf16> to vector<1x8x128xbf16>
      tpu.vector_store %arg6[%c0_32, %c0_33, %c0_34], %54 {strides = array<i32>} : memref<1x8x128xbf16, #tpu.memory_space<vmem>>, vector<1x8x128xbf16>,
    } else {
    }
    return
  }
  func.func @transform_0(%arg0: i32, %arg1: i32, %arg2: i32) -> (i32, i32, i32) {
    %c0_i32 = arith.constant 0 : i32
    %c0_i32_0 = arith.constant 0 : i32
    return %arg0, %arg1, %c0_i32 : i32, i32, i32
  }
  func.func @transform_1(%arg0: i32, %arg1: i32, %arg2: i32) -> (i32, i32, i32) {
    %c0_i32 = arith.constant 0 : i32
    %c0_i32_0 = arith.constant 0 : i32
    return %arg0, %arg2, %c0_i32 : i32, i32, i32
  }
  func.func @transform_2(%arg0: i32, %arg1: i32, %arg2: i32) -> (i32, i32, i32) {
    %c0_i32 = arith.constant 0 : i32
    %c0_i32_0 = arith.constant 0 : i32
    return %arg0, %arg2, %c0_i32 : i32, i32, i32
  }
  func.func @transform_3(%arg0: i32, %arg1: i32, %arg2: i32) -> (i32, i32, i32) {
    %c0_i32 = arith.constant 0 : i32
    %c0_i32_0 = arith.constant 0 : i32
    return %arg0, %arg1, %c0_i32 : i32, i32, i32
  }
}

module attributes {stable_mosaic.version = 11 : i64} {
  func.func @_matmul_bias_kernel(%arg0: i32, %arg1: i32, %arg2: i32, %arg3: memref<8x128xbf16, #tpu.memory_space<vmem>>, %arg4: memref<128x128xbf16, #tpu.memory_space<vmem>>, %arg5: memref<1x128xf32, #tpu.memory_space<vmem>>, %arg6: memref<8x128xbf16, #tpu.memory_space<vmem>>, %arg7: memref<8x128xf32, #tpu.memory_space<vmem>>) attributes {dimension_semantics = [#tpu.dimension_semantics<parallel>, #tpu.dimension_semantics<parallel>, #tpu.dimension_semantics<arbitrary>], iteration_bounds = array<i64: 1, 1, 1>, scalar_prefetch = 0 : i64, scratch_operands = 1 : i64, tpu.core_type = #tpu.core_type<tc>, window_params = [{transform_indices = @transform_0, window_bounds = array<i64: 8, 128>}, {transform_indices = @transform_1, window_bounds = array<i64: 128, 128>}, {transform_indices = @transform_2, window_bounds = array<i64: 1, 128>}, {transform_indices = @transform_3, window_bounds = array<i64: 8, 128>}]} {
    %c0_i32 = arith.constant 0 : i32
    %0 = arith.cmpi eq, %arg2, %c0_i32 : i32
    %1 = arith.extui %0 : i1 to i32
    %c0_i32_0 = arith.constant 0 : i32
    %2 = arith.cmpi ne, %1, %c0_i32_0 : i32
    scf.if %2 {
      %cst_10 = arith.constant 0.000000e+00 : f32
      %12 = vector.broadcast %cst_10 : f32 to vector<8x128xf32>
      %c0_11 = arith.constant 0 : index
      %c0_12 = arith.constant 0 : index
      %13 = vector.load %arg7[%c0_11, %c0_12] : memref<8x128xf32, #tpu.memory_space<vmem>>, vector<8x128xf32>
      tpu.vector_store %arg7[%c0_11, %c0_12], %12 {strides = array<i32>} : memref<8x128xf32, #tpu.memory_space<vmem>>, vector<8x128xf32>,
    } else {
    }
    %c0 = arith.constant 0 : index
    %c0_1 = arith.constant 0 : index
    %3 = vector.load %arg7[%c0, %c0_1] : memref<8x128xf32, #tpu.memory_space<vmem>>, vector<8x128xf32>
    %c0_2 = arith.constant 0 : index
    %c0_3 = arith.constant 0 : index
    %4 = vector.load %arg3[%c0_2, %c0_3] : memref<8x128xbf16, #tpu.memory_space<vmem>>, vector<8x128xbf16>
    %c0_4 = arith.constant 0 : index
    %c0_5 = arith.constant 0 : index
    %5 = vector.load %arg4[%c0_4, %c0_5] : memref<128x128xbf16, #tpu.memory_space<vmem>>, vector<128x128xbf16>
    %cst = arith.constant dense<0.000000e+00> : vector<8x128xf32>
    %6 = tpu.matmul %4, %5, %cst {dimension_numbers = #tpu.dot_dimension_numbers<[1], [0], [0], [1], [0, 0, 1, 1], [], []>} : vector<8x128xbf16>, vector<128x128xbf16>, vector<8x128xf32> -> vector<8x128xf32>
    %7 = arith.addf %3, %6 : vector<8x128xf32>
    %c0_6 = arith.constant 0 : index
    %c0_7 = arith.constant 0 : index
    %8 = vector.load %arg7[%c0_6, %c0_7] : memref<8x128xf32, #tpu.memory_space<vmem>>, vector<8x128xf32>
    tpu.vector_store %arg7[%c0_6, %c0_7], %7 {strides = array<i32>} : memref<8x128xf32, #tpu.memory_space<vmem>>, vector<8x128xf32>,
    %c0_i32_8 = arith.constant 0 : i32
    %9 = arith.cmpi eq, %arg2, %c0_i32_8 : i32
    %10 = arith.extui %9 : i1 to i32
    %c0_i32_9 = arith.constant 0 : i32
    %11 = arith.cmpi ne, %10, %c0_i32_9 : i32
    scf.if %11 {
      %c0_10 = arith.constant 0 : index
      %c0_11 = arith.constant 0 : index
      %12 = vector.load %arg7[%c0_10, %c0_11] : memref<8x128xf32, #tpu.memory_space<vmem>>, vector<8x128xf32>
      %c0_12 = arith.constant 0 : index
      %c0_13 = arith.constant 0 : index
      %13 = vector.load %arg5[%c0_12, %c0_13] : memref<1x128xf32, #tpu.memory_space<vmem>>, vector<1x128xf32>
      %14 = vector.broadcast %13 : vector<1x128xf32> to vector<8x128xf32>
      %15 = arith.addf %12, %14 : vector<8x128xf32>
      %16 = arith.truncf %15 : vector<8x128xf32> to vector<8x128xbf16>
      %c0_14 = arith.constant 0 : index
      %c0_15 = arith.constant 0 : index
      %17 = vector.load %arg6[%c0_14, %c0_15] : memref<8x128xbf16, #tpu.memory_space<vmem>>, vector<8x128xbf16>
      tpu.vector_store %arg6[%c0_14, %c0_15], %16 {strides = array<i32>} : memref<8x128xbf16, #tpu.memory_space<vmem>>, vector<8x128xbf16>,
    } else {
    }
    return
  }
  func.func @transform_0(%arg0: i32, %arg1: i32, %arg2: i32) -> (i32, i32) {
    %c0_i32 = arith.constant 0 : i32
    return %arg0, %arg2 : i32, i32
  }
  func.func @transform_1(%arg0: i32, %arg1: i32, %arg2: i32) -> (i32, i32) {
    %c0_i32 = arith.constant 0 : i32
    return %arg2, %arg1 : i32, i32
  }
  func.func @transform_2(%arg0: i32, %arg1: i32, %arg2: i32) -> (i32, i32) {
    %c0_i32 = arith.constant 0 : i32
    %c0_i32_0 = arith.constant 0 : i32
    return %c0_i32, %arg1 : i32, i32
  }
  func.func @transform_3(%arg0: i32, %arg1: i32, %arg2: i32) -> (i32, i32) {
    %c0_i32 = arith.constant 0 : i32
    return %arg0, %arg1 : i32, i32
  }
}

module attributes {stable_mosaic.version = 11 : i64} {
  func.func @_layernorm_kernel(%arg0: i32, %arg1: memref<16x16xbf16, #tpu.memory_space<vmem>>, %arg2: memref<1x16xf32, #tpu.memory_space<vmem>>, %arg3: memref<1x16xf32, #tpu.memory_space<vmem>>, %arg4: memref<16x16xbf16, #tpu.memory_space<vmem>>) attributes {dimension_semantics = [#tpu.dimension_semantics<parallel>], iteration_bounds = array<i64: 1>, scalar_prefetch = 0 : i64, scratch_operands = 0 : i64, tpu.core_type = #tpu.core_type<tc>, window_params = [{transform_indices = @transform_0, window_bounds = array<i64: 16, 16>}, {pipeline_mode = #tpu.pipeline_mode<synchronous>, transform_indices = @transform_1, window_bounds = array<i64: 1, 16>}, {pipeline_mode = #tpu.pipeline_mode<synchronous>, transform_indices = @transform_2, window_bounds = array<i64: 1, 16>}, {transform_indices = @transform_3, window_bounds = array<i64: 16, 16>}]} {
    %c0 = arith.constant 0 : index
    %c0_0 = arith.constant 0 : index
    %0 = vector.load %arg1[%c0, %c0_0] : memref<16x16xbf16, #tpu.memory_space<vmem>>, vector<16x16xbf16>
    %1 = arith.extf %0 : vector<16x16xbf16> to vector<16x16xf32>
    %cst = arith.constant dense<0.000000e+00> : vector<16xf32>
    %2 = vector.multi_reduction <add>, %1, %cst [1] : vector<16x16xf32> to vector<16xf32>
    %3 = vector.shape_cast %2 : vector<16xf32> to vector<16x1xf32>
    %cst_1 = arith.constant 1.600000e+01 : f32
    %4 = vector.broadcast %cst_1 : f32 to vector<16x1xf32>
    %5 = arith.divf %3, %4 : vector<16x1xf32>
    %6 = vector.broadcast %5 : vector<16x1xf32> to vector<16x16xf32>
    %7 = arith.subf %1, %6 : vector<16x16xf32>
    %8 = arith.mulf %7, %7 : vector<16x16xf32>
    %cst_2 = arith.constant dense<0.000000e+00> : vector<16xf32>
    %9 = vector.multi_reduction <add>, %8, %cst_2 [1] : vector<16x16xf32> to vector<16xf32>
    %10 = vector.shape_cast %9 : vector<16xf32> to vector<16x1xf32>
    %cst_3 = arith.constant 1.600000e+01 : f32
    %11 = vector.broadcast %cst_3 : f32 to vector<16x1xf32>
    %12 = arith.divf %10, %11 : vector<16x1xf32>
    %cst_4 = arith.constant 9.99999974E-6 : f32
    %13 = vector.broadcast %cst_4 : f32 to vector<16x1xf32>
    %14 = arith.addf %12, %13 : vector<16x1xf32>
    %15 = math.rsqrt %14 : vector<16x1xf32>
    %16 = vector.broadcast %15 : vector<16x1xf32> to vector<16x16xf32>
    %17 = arith.mulf %7, %16 : vector<16x16xf32>
    %c0_5 = arith.constant 0 : index
    %c0_6 = arith.constant 0 : index
    %18 = vector.load %arg2[%c0_5, %c0_6] : memref<1x16xf32, #tpu.memory_space<vmem>>, vector<1x16xf32>
    %19 = vector.broadcast %18 : vector<1x16xf32> to vector<16x16xf32>
    %20 = arith.mulf %17, %19 : vector<16x16xf32>
    %c0_7 = arith.constant 0 : index
    %c0_8 = arith.constant 0 : index
    %21 = vector.load %arg3[%c0_7, %c0_8] : memref<1x16xf32, #tpu.memory_space<vmem>>, vector<1x16xf32>
    %22 = vector.broadcast %21 : vector<1x16xf32> to vector<16x16xf32>
    %23 = arith.addf %20, %22 : vector<16x16xf32>
    %24 = arith.truncf %23 : vector<16x16xf32> to vector<16x16xbf16>
    %c0_9 = arith.constant 0 : index
    %c0_10 = arith.constant 0 : index
    %25 = vector.load %arg4[%c0_9, %c0_10] : memref<16x16xbf16, #tpu.memory_space<vmem>>, vector<16x16xbf16>
    tpu.vector_store %arg4[%c0_9, %c0_10], %24 {strides = array<i32>} : memref<16x16xbf16, #tpu.memory_space<vmem>>, vector<16x16xbf16>,
    return
  }
  func.func @transform_0(%arg0: i32) -> (i32, i32) {
    %c0_i32 = arith.constant 0 : i32
    %c0_i32_0 = arith.constant 0 : i32
    return %arg0, %c0_i32 : i32, i32
  }
  func.func @transform_1(%arg0: i32) -> (i32, i32) {
    %c0_i32 = arith.constant 0 : i32
    %c0_i32_0 = arith.constant 0 : i32
    %c0_i32_1 = arith.constant 0 : i32
    return %c0_i32, %c0_i32_0 : i32, i32
  }
  func.func @transform_2(%arg0: i32) -> (i32, i32) {
    %c0_i32 = arith.constant 0 : i32
    %c0_i32_0 = arith.constant 0 : i32
    %c0_i32_1 = arith.constant 0 : i32
    return %c0_i32, %c0_i32_0 : i32, i32
  }
  func.func @transform_3(%arg0: i32) -> (i32, i32) {
    %c0_i32 = arith.constant 0 : i32
    %c0_i32_0 = arith.constant 0 : i32
    return %arg0, %c0_i32 : i32, i32
  }
}

module attributes {stable_mosaic.version = 11 : i64} {
  func.func @_matmul_kernel(%arg0: i32, %arg1: i32, %arg2: i32, %arg3: memref<16x128xbf16, #tpu.memory_space<vmem>>, %arg4: memref<128x128xbf16, #tpu.memory_space<vmem>>, %arg5: memref<16x128xbf16, #tpu.memory_space<vmem>>, %arg6: memref<16x128xf32, #tpu.memory_space<vmem>>) attributes {dimension_semantics = [#tpu.dimension_semantics<parallel>, #tpu.dimension_semantics<parallel>, #tpu.dimension_semantics<arbitrary>], iteration_bounds = array<i64: 1, 1, 1>, scalar_prefetch = 0 : i64, scratch_operands = 1 : i64, tpu.core_type = #tpu.core_type<tc>, window_params = [{transform_indices = @transform_0, window_bounds = array<i64: 16, 128>}, {transform_indices = @transform_1, window_bounds = array<i64: 128, 128>}, {transform_indices = @transform_2, window_bounds = array<i64: 16, 128>}]} {
    %c0_i32 = arith.constant 0 : i32
    %0 = arith.cmpi eq, %arg2, %c0_i32 : i32
    %1 = arith.extui %0 : i1 to i32
    %c0_i32_0 = arith.constant 0 : i32
    %2 = arith.cmpi ne, %1, %c0_i32_0 : i32
    scf.if %2 {
      %cst_10 = arith.constant 0.000000e+00 : f32
      %12 = vector.broadcast %cst_10 : f32 to vector<16x128xf32>
      %c0_11 = arith.constant 0 : index
      %c0_12 = arith.constant 0 : index
      %13 = vector.load %arg6[%c0_11, %c0_12] : memref<16x128xf32, #tpu.memory_space<vmem>>, vector<16x128xf32>
      tpu.vector_store %arg6[%c0_11, %c0_12], %12 {strides = array<i32>} : memref<16x128xf32, #tpu.memory_space<vmem>>, vector<16x128xf32>,
    } else {
    }
    %c0 = arith.constant 0 : index
    %c0_1 = arith.constant 0 : index
    %3 = vector.load %arg6[%c0, %c0_1] : memref<16x128xf32, #tpu.memory_space<vmem>>, vector<16x128xf32>
    %c0_2 = arith.constant 0 : index
    %c0_3 = arith.constant 0 : index
    %4 = vector.load %arg3[%c0_2, %c0_3] : memref<16x128xbf16, #tpu.memory_space<vmem>>, vector<16x128xbf16>
    %c0_4 = arith.constant 0 : index
    %c0_5 = arith.constant 0 : index
    %5 = vector.load %arg4[%c0_4, %c0_5] : memref<128x128xbf16, #tpu.memory_space<vmem>>, vector<128x128xbf16>
    %cst = arith.constant dense<0.000000e+00> : vector<16x128xf32>
    %6 = tpu.matmul %4, %5, %cst {dimension_numbers = #tpu.dot_dimension_numbers<[1], [0], [0], [1], [0, 0, 1, 1], [], []>} : vector<16x128xbf16>, vector<128x128xbf16>, vector<16x128xf32> -> vector<16x128xf32>
    %7 = arith.addf %3, %6 : vector<16x128xf32>
    %c0_6 = arith.constant 0 : index
    %c0_7 = arith.constant 0 : index
    %8 = vector.load %arg6[%c0_6, %c0_7] : memref<16x128xf32, #tpu.memory_space<vmem>>, vector<16x128xf32>
    tpu.vector_store %arg6[%c0_6, %c0_7], %7 {strides = array<i32>} : memref<16x128xf32, #tpu.memory_space<vmem>>, vector<16x128xf32>,
    %c0_i32_8 = arith.constant 0 : i32
    %9 = arith.cmpi eq, %arg2, %c0_i32_8 : i32
    %10 = arith.extui %9 : i1 to i32
    %c0_i32_9 = arith.constant 0 : i32
    %11 = arith.cmpi ne, %10, %c0_i32_9 : i32
    scf.if %11 {
      %c0_10 = arith.constant 0 : index
      %c0_11 = arith.constant 0 : index
      %12 = vector.load %arg6[%c0_10, %c0_11] : memref<16x128xf32, #tpu.memory_space<vmem>>, vector<16x128xf32>
      %13 = arith.truncf %12 : vector<16x128xf32> to vector<16x128xbf16>
      %c0_12 = arith.constant 0 : index
      %c0_13 = arith.constant 0 : index
      %14 = vector.load %arg5[%c0_12, %c0_13] : memref<16x128xbf16, #tpu.memory_space<vmem>>, vector<16x128xbf16>
      tpu.vector_store %arg5[%c0_12, %c0_13], %13 {strides = array<i32>} : memref<16x128xbf16, #tpu.memory_space<vmem>>, vector<16x128xbf16>,
    } else {
    }
    return
  }
  func.func @transform_0(%arg0: i32, %arg1: i32, %arg2: i32) -> (i32, i32) {
    %c0_i32 = arith.constant 0 : i32
    return %arg0, %arg2 : i32, i32
  }
  func.func @transform_1(%arg0: i32, %arg1: i32, %arg2: i32) -> (i32, i32) {
    %c0_i32 = arith.constant 0 : i32
    return %arg2, %arg1 : i32, i32
  }
  func.func @transform_2(%arg0: i32, %arg1: i32, %arg2: i32) -> (i32, i32) {
    %c0_i32 = arith.constant 0 : i32
    return %arg0, %arg1 : i32, i32
  }
}

module attributes {stable_mosaic.version = 11 : i64} {
  func.func @_flash_attn_kernel(%arg0: i32, %arg1: i32, %arg2: i32, %arg3: memref<1x8x128xbf16, #tpu.memory_space<vmem>>, %arg4: memref<1x8x128xbf16, #tpu.memory_space<vmem>>, %arg5: memref<1x8x128xbf16, #tpu.memory_space<vmem>>, %arg6: memref<1x8x128xbf16, #tpu.memory_space<vmem>>, %arg7: memref<8x1xf32, #tpu.memory_space<vmem>>, %arg8: memref<8x1xf32, #tpu.memory_space<vmem>>, %arg9: memref<8x128xf32, #tpu.memory_space<vmem>>) attributes {dimension_semantics = [#tpu.dimension_semantics<parallel>, #tpu.dimension_semantics<parallel>, #tpu.dimension_semantics<arbitrary>], iteration_bounds = array<i64: 4, 1, 1>, scalar_prefetch = 0 : i64, scratch_operands = 3 : i64, tpu.core_type = #tpu.core_type<tc>, window_params = [{transform_indices = @transform_0, window_bounds = array<i64: 1, 8, 128>}, {transform_indices = @transform_1, window_bounds = array<i64: 1, 8, 128>}, {transform_indices = @transform_2, window_bounds = array<i64: 1, 8, 128>}, {transform_indices = @transform_3, window_bounds = array<i64: 1, 8, 128>}]} {
    %c0_i32 = arith.constant 0 : i32
    %0 = arith.cmpi eq, %arg2, %c0_i32 : i32
    %1 = arith.extui %0 : i1 to i32
    %c0_i32_0 = arith.constant 0 : i32
    %2 = arith.cmpi ne, %1, %c0_i32_0 : i32
    scf.if %2 {
      %cst_29 = arith.constant 0xFF800000 : f32
      %46 = vector.broadcast %cst_29 : f32 to vector<8x1xf32>
      %c0_30 = arith.constant 0 : index
      %c0_31 = arith.constant 0 : index
      %47 = vector.load %arg7[%c0_30, %c0_31] : memref<8x1xf32, #tpu.memory_space<vmem>>, vector<8x1xf32>
      tpu.vector_store %arg7[%c0_30, %c0_31], %46 {strides = array<i32>} : memref<8x1xf32, #tpu.memory_space<vmem>>, vector<8x1xf32>,
      %cst_32 = arith.constant 0.000000e+00 : f32
      %48 = vector.broadcast %cst_32 : f32 to vector<8x1xf32>
      %c0_33 = arith.constant 0 : index
      %c0_34 = arith.constant 0 : index
      %49 = vector.load %arg8[%c0_33, %c0_34] : memref<8x1xf32, #tpu.memory_space<vmem>>, vector<8x1xf32>
      tpu.vector_store %arg8[%c0_33, %c0_34], %48 {strides = array<i32>} : memref<8x1xf32, #tpu.memory_space<vmem>>, vector<8x1xf32>,
      %cst_35 = arith.constant 0.000000e+00 : f32
      %50 = vector.broadcast %cst_35 : f32 to vector<8x128xf32>
      %c0_36 = arith.constant 0 : index
      %c0_37 = arith.constant 0 : index
      %51 = vector.load %arg9[%c0_36, %c0_37] : memref<8x128xf32, #tpu.memory_space<vmem>>, vector<8x128xf32>
      tpu.vector_store %arg9[%c0_36, %c0_37], %50 {strides = array<i32>} : memref<8x128xf32, #tpu.memory_space<vmem>>, vector<8x128xf32>,
    } else {
    }
    %c0 = arith.constant 0 : index
    %c0_1 = arith.constant 0 : index
    %c0_2 = arith.constant 0 : index
    %3 = vector.load %arg3[%c0, %c0_1, %c0_2] : memref<1x8x128xbf16, #tpu.memory_space<vmem>>, vector<1x8x128xbf16>
    %4 = vector.shape_cast %3 : vector<1x8x128xbf16> to vector<8x128xbf16>
    %c0_3 = arith.constant 0 : index
    %c0_4 = arith.constant 0 : index
    %c0_5 = arith.constant 0 : index
    %5 = vector.load %arg4[%c0_3, %c0_4, %c0_5] : memref<1x8x128xbf16, #tpu.memory_space<vmem>>, vector<1x8x128xbf16>
    %6 = vector.shape_cast %5 : vector<1x8x128xbf16> to vector<8x128xbf16>
    %cst = arith.constant dense<0.000000e+00> : vector<8x8xf32>
    %7 = tpu.matmul %4, %6, %cst {dimension_numbers = #tpu.dot_dimension_numbers<[1], [1], [0], [0], [0, 0, 1, 0], [], []>} : vector<8x128xbf16>, vector<8x128xbf16>, vector<8x8xf32> -> vector<8x8xf32>
    %cst_6 = arith.constant 0.353553385 : f32
    %8 = vector.broadcast %cst_6 : f32 to vector<8x8xf32>
    %9 = arith.mulf %7, %8 : vector<8x8xf32>
    %10 = tpu.iota {dimensions = array<i32: 1>} : vector<8x8xi32>
    %c8_i32 = arith.constant 8 : i32
    %11 = arith.muli %arg2, %c8_i32 : i32
    %12 = vector.broadcast %11 : i32 to vector<8x8xi32>
    %13 = arith.addi %10, %12 : vector<8x8xi32>
    %c8_i32_7 = arith.constant 8 : i32
    %14 = vector.broadcast %c8_i32_7 : i32 to vector<8x8xi32>
    %15 = arith.cmpi slt, %13, %14 : vector<8x8xi32>
    %cst_8 = arith.constant 0xFF800000 : f32
    %16 = vector.broadcast %cst_8 : f32 to vector<8x8xf32>
    %17 = arith.select %15, %9, %16 : vector<8x8xi1>, vector<8x8xf32>
    %c0_9 = arith.constant 0 : index
    %c0_10 = arith.constant 0 : index
    %18 = vector.load %arg7[%c0_9, %c0_10] : memref<8x1xf32, #tpu.memory_space<vmem>>, vector<8x1xf32>
    %cst_11 = arith.constant dense<0xFF800000> : vector<8xf32>
    %19 = vector.multi_reduction <maximumf>, %17, %cst_11 [1] : vector<8x8xf32> to vector<8xf32>
    %20 = vector.shape_cast %19 : vector<8xf32> to vector<8x1xf32>
    %21 = arith.maximumf %18, %20 : vector<8x1xf32>
    %22 = arith.subf %18, %21 : vector<8x1xf32>
    %23 = math.exp %22 : vector<8x1xf32>
    %24 = vector.broadcast %21 : vector<8x1xf32> to vector<8x8xf32>
    %25 = arith.subf %17, %24 : vector<8x8xf32>
    %26 = math.exp %25 : vector<8x8xf32>
    %c0_12 = arith.constant 0 : index
    %c0_13 = arith.constant 0 : index
    %27 = vector.load %arg8[%c0_12, %c0_13] : memref<8x1xf32, #tpu.memory_space<vmem>>, vector<8x1xf32>
    %28 = arith.mulf %23, %27 : vector<8x1xf32>
    %cst_14 = arith.constant dense<0.000000e+00> : vector<8xf32>
    %29 = vector.multi_reduction <add>, %26, %cst_14 [1] : vector<8x8xf32> to vector<8xf32>
    %30 = vector.shape_cast %29 : vector<8xf32> to vector<8x1xf32>
    %31 = arith.addf %28, %30 : vector<8x1xf32>
    %c0_15 = arith.constant 0 : index
    %c0_16 = arith.constant 0 : index
    %32 = vector.load %arg8[%c0_15, %c0_16] : memref<8x1xf32, #tpu.memory_space<vmem>>, vector<8x1xf32>
    tpu.vector_store %arg8[%c0_15, %c0_16], %31 {strides = array<i32>} : memref<8x1xf32, #tpu.memory_space<vmem>>, vector<8x1xf32>,
    %c0_17 = arith.constant 0 : index
    %c0_18 = arith.constant 0 : index
    %33 = vector.load %arg9[%c0_17, %c0_18] : memref<8x128xf32, #tpu.memory_space<vmem>>, vector<8x128xf32>
    %34 = vector.broadcast %23 : vector<8x1xf32> to vector<8x128xf32>
    %35 = arith.mulf %34, %33 : vector<8x128xf32>
    %36 = arith.truncf %26 : vector<8x8xf32> to vector<8x8xbf16>
    %c0_19 = arith.constant 0 : index
    %c0_20 = arith.constant 0 : index
    %c0_21 = arith.constant 0 : index
    %37 = vector.load %arg5[%c0_19, %c0_20, %c0_21] : memref<1x8x128xbf16, #tpu.memory_space<vmem>>, vector<1x8x128xbf16>
    %38 = vector.shape_cast %37 : vector<1x8x128xbf16> to vector<8x128xbf16>
    %cst_22 = arith.constant dense<0.000000e+00> : vector<8x128xf32>
    %39 = tpu.matmul %36, %38, %cst_22 {dimension_numbers = #tpu.dot_dimension_numbers<[1], [0], [0], [1], [0, 0, 1, 1], [], []>} : vector<8x8xbf16>, vector<8x128xbf16>, vector<8x128xf32> -> vector<8x128xf32>
    %40 = arith.addf %35, %39 : vector<8x128xf32>
    %c0_23 = arith.constant 0 : index
    %c0_24 = arith.constant 0 : index
    %41 = vector.load %arg9[%c0_23, %c0_24] : memref<8x128xf32, #tpu.memory_space<vmem>>, vector<8x128xf32>
    tpu.vector_store %arg9[%c0_23, %c0_24], %40 {strides = array<i32>} : memref<8x128xf32, #tpu.memory_space<vmem>>, vector<8x128xf32>,
    %c0_25 = arith.constant 0 : index
    %c0_26 = arith.constant 0 : index
    %42 = vector.load %arg7[%c0_25, %c0_26] : memref<8x1xf32, #tpu.memory_space<vmem>>, vector<8x1xf32>
    tpu.vector_store %arg7[%c0_25, %c0_26], %21 {strides = array<i32>} : memref<8x1xf32, #tpu.memory_space<vmem>>, vector<8x1xf32>,
    %c0_i32_27 = arith.constant 0 : i32
    %43 = arith.cmpi eq, %arg2, %c0_i32_27 : i32
    %44 = arith.extui %43 : i1 to i32
    %c0_i32_28 = arith.constant 0 : i32
    %45 = arith.cmpi ne, %44, %c0_i32_28 : i32
    scf.if %45 {
      %c0_29 = arith.constant 0 : index
      %c0_30 = arith.constant 0 : index
      %46 = vector.load %arg9[%c0_29, %c0_30] : memref<8x128xf32, #tpu.memory_space<vmem>>, vector<8x128xf32>
      %c0_31 = arith.constant 0 : index
      %c0_32 = arith.constant 0 : index
      %47 = vector.load %arg8[%c0_31, %c0_32] : memref<8x1xf32, #tpu.memory_space<vmem>>, vector<8x1xf32>
      %48 = tpu.reciprocal %47 {approx = true} : vector<8x1xf32> -> vector<8x1xf32>
      %49 = vector.broadcast %48 : vector<8x1xf32> to vector<8x128xf32>
      %50 = arith.mulf %46, %49 : vector<8x128xf32>
      %51 = arith.truncf %50 : vector<8x128xf32> to vector<8x128xbf16>
      %c0_33 = arith.constant 0 : index
      %c0_34 = arith.constant 0 : index
      %c0_35 = arith.constant 0 : index
      %52 = vector.load %arg6[%c0_33, %c0_34, %c0_35] : memref<1x8x128xbf16, #tpu.memory_space<vmem>>, vector<1x8x128xbf16>
      %53 = vector.shape_cast %52 : vector<1x8x128xbf16> to vector<8x128xbf16>
      %54 = vector.shape_cast %51 : vector<8x128xbf16> to vector<1x8x128xbf16>
      tpu.vector_store %arg6[%c0_33, %c0_34, %c0_35], %54 {strides = array<i32>} : memref<1x8x128xbf16, #tpu.memory_space<vmem>>, vector<1x8x128xbf16>,
    } else {
    }
    return
  }
  func.func @transform_0(%arg0: i32, %arg1: i32, %arg2: i32) -> (i32, i32, i32) {
    %c0_i32 = arith.constant 0 : i32
    %c0_i32_0 = arith.constant 0 : i32
    return %arg0, %arg1, %c0_i32 : i32, i32, i32
  }
  func.func @transform_1(%arg0: i32, %arg1: i32, %arg2: i32) -> (i32, i32, i32) {
    %c0_i32 = arith.constant 0 : i32
    %c0_i32_0 = arith.constant 0 : i32
    return %arg0, %arg2, %c0_i32 : i32, i32, i32
  }
  func.func @transform_2(%arg0: i32, %arg1: i32, %arg2: i32) -> (i32, i32, i32) {
    %c0_i32 = arith.constant 0 : i32
    %c0_i32_0 = arith.constant 0 : i32
    return %arg0, %arg2, %c0_i32 : i32, i32, i32
  }
  func.func @transform_3(%arg0: i32, %arg1: i32, %arg2: i32) -> (i32, i32, i32) {
    %c0_i32 = arith.constant 0 : i32
    %c0_i32_0 = arith.constant 0 : i32
    return %arg0, %arg1, %c0_i32 : i32, i32, i32
  }
}

module attributes {stable_mosaic.version = 11 : i64} {
  func.func @_matmul_bias_kernel(%arg0: i32, %arg1: i32, %arg2: i32, %arg3: memref<16x128xbf16, #tpu.memory_space<vmem>>, %arg4: memref<128x128xbf16, #tpu.memory_space<vmem>>, %arg5: memref<1x128xf32, #tpu.memory_space<vmem>>, %arg6: memref<16x128xbf16, #tpu.memory_space<vmem>>, %arg7: memref<16x128xf32, #tpu.memory_space<vmem>>) attributes {dimension_semantics = [#tpu.dimension_semantics<parallel>, #tpu.dimension_semantics<parallel>, #tpu.dimension_semantics<arbitrary>], iteration_bounds = array<i64: 1, 1, 1>, scalar_prefetch = 0 : i64, scratch_operands = 1 : i64, tpu.core_type = #tpu.core_type<tc>, window_params = [{transform_indices = @transform_0, window_bounds = array<i64: 16, 128>}, {transform_indices = @transform_1, window_bounds = array<i64: 128, 128>}, {transform_indices = @transform_2, window_bounds = array<i64: 1, 128>}, {transform_indices = @transform_3, window_bounds = array<i64: 16, 128>}]} {
    %c0_i32 = arith.constant 0 : i32
    %0 = arith.cmpi eq, %arg2, %c0_i32 : i32
    %1 = arith.extui %0 : i1 to i32
    %c0_i32_0 = arith.constant 0 : i32
    %2 = arith.cmpi ne, %1, %c0_i32_0 : i32
    scf.if %2 {
      %cst_10 = arith.constant 0.000000e+00 : f32
      %12 = vector.broadcast %cst_10 : f32 to vector<16x128xf32>
      %c0_11 = arith.constant 0 : index
      %c0_12 = arith.constant 0 : index
      %13 = vector.load %arg7[%c0_11, %c0_12] : memref<16x128xf32, #tpu.memory_space<vmem>>, vector<16x128xf32>
      tpu.vector_store %arg7[%c0_11, %c0_12], %12 {strides = array<i32>} : memref<16x128xf32, #tpu.memory_space<vmem>>, vector<16x128xf32>,
    } else {
    }
    %c0 = arith.constant 0 : index
    %c0_1 = arith.constant 0 : index
    %3 = vector.load %arg7[%c0, %c0_1] : memref<16x128xf32, #tpu.memory_space<vmem>>, vector<16x128xf32>
    %c0_2 = arith.constant 0 : index
    %c0_3 = arith.constant 0 : index
    %4 = vector.load %arg3[%c0_2, %c0_3] : memref<16x128xbf16, #tpu.memory_space<vmem>>, vector<16x128xbf16>
    %c0_4 = arith.constant 0 : index
    %c0_5 = arith.constant 0 : index
    %5 = vector.load %arg4[%c0_4, %c0_5] : memref<128x128xbf16, #tpu.memory_space<vmem>>, vector<128x128xbf16>
    %cst = arith.constant dense<0.000000e+00> : vector<16x128xf32>
    %6 = tpu.matmul %4, %5, %cst {dimension_numbers = #tpu.dot_dimension_numbers<[1], [0], [0], [1], [0, 0, 1, 1], [], []>} : vector<16x128xbf16>, vector<128x128xbf16>, vector<16x128xf32> -> vector<16x128xf32>
    %7 = arith.addf %3, %6 : vector<16x128xf32>
    %c0_6 = arith.constant 0 : index
    %c0_7 = arith.constant 0 : index
    %8 = vector.load %arg7[%c0_6, %c0_7] : memref<16x128xf32, #tpu.memory_space<vmem>>, vector<16x128xf32>
    tpu.vector_store %arg7[%c0_6, %c0_7], %7 {strides = array<i32>} : memref<16x128xf32, #tpu.memory_space<vmem>>, vector<16x128xf32>,
    %c0_i32_8 = arith.constant 0 : i32
    %9 = arith.cmpi eq, %arg2, %c0_i32_8 : i32
    %10 = arith.extui %9 : i1 to i32
    %c0_i32_9 = arith.constant 0 : i32
    %11 = arith.cmpi ne, %10, %c0_i32_9 : i32
    scf.if %11 {
      %c0_10 = arith.constant 0 : index
      %c0_11 = arith.constant 0 : index
      %12 = vector.load %arg7[%c0_10, %c0_11] : memref<16x128xf32, #tpu.memory_space<vmem>>, vector<16x128xf32>
      %c0_12 = arith.constant 0 : index
      %c0_13 = arith.constant 0 : index
      %13 = vector.load %arg5[%c0_12, %c0_13] : memref<1x128xf32, #tpu.memory_space<vmem>>, vector<1x128xf32>
      %14 = vector.broadcast %13 : vector<1x128xf32> to vector<16x128xf32>
      %15 = arith.addf %12, %14 : vector<16x128xf32>
      %16 = arith.truncf %15 : vector<16x128xf32> to vector<16x128xbf16>
      %c0_14 = arith.constant 0 : index
      %c0_15 = arith.constant 0 : index
      %17 = vector.load %arg6[%c0_14, %c0_15] : memref<16x128xbf16, #tpu.memory_space<vmem>>, vector<16x128xbf16>
      tpu.vector_store %arg6[%c0_14, %c0_15], %16 {strides = array<i32>} : memref<16x128xbf16, #tpu.memory_space<vmem>>, vector<16x128xbf16>,
    } else {
    }
    return
  }
  func.func @transform_0(%arg0: i32, %arg1: i32, %arg2: i32) -> (i32, i32) {
    %c0_i32 = arith.constant 0 : i32
    return %arg0, %arg2 : i32, i32
  }
  func.func @transform_1(%arg0: i32, %arg1: i32, %arg2: i32) -> (i32, i32) {
    %c0_i32 = arith.constant 0 : i32
    return %arg2, %arg1 : i32, i32
  }
  func.func @transform_2(%arg0: i32, %arg1: i32, %arg2: i32) -> (i32, i32) {
    %c0_i32 = arith.constant 0 : i32
    %c0_i32_0 = arith.constant 0 : i32
    return %c0_i32, %arg1 : i32, i32
  }
  func.func @transform_3(%arg0: i32, %arg1: i32, %arg2: i32) -> (i32, i32) {
    %c0_i32 = arith.constant 0 : i32
    return %arg0, %arg1 : i32, i32
  }
}

module attributes {stable_mosaic.version = 11 : i64} {
  func.func @_layernorm_kernel(%arg0: i32, %arg1: memref<8x16xbf16, #tpu.memory_space<vmem>>, %arg2: memref<1x16xf32, #tpu.memory_space<vmem>>, %arg3: memref<1x16xf32, #tpu.memory_space<vmem>>, %arg4: memref<8x16xbf16, #tpu.memory_space<vmem>>) attributes {dimension_semantics = [#tpu.dimension_semantics<parallel>], iteration_bounds = array<i64: 1>, scalar_prefetch = 0 : i64, scratch_operands = 0 : i64, tpu.core_type = #tpu.core_type<tc>, window_params = [{transform_indices = @transform_0, window_bounds = array<i64: 8, 16>}, {pipeline_mode = #tpu.pipeline_mode<synchronous>, transform_indices = @transform_1, window_bounds = array<i64: 1, 16>}, {pipeline_mode = #tpu.pipeline_mode<synchronous>, transform_indices = @transform_2, window_bounds = array<i64: 1, 16>}, {transform_indices = @transform_3, window_bounds = array<i64: 8, 16>}]} {
    %c0 = arith.constant 0 : index
    %c0_0 = arith.constant 0 : index
    %0 = vector.load %arg1[%c0, %c0_0] : memref<8x16xbf16, #tpu.memory_space<vmem>>, vector<8x16xbf16>
    %1 = arith.extf %0 : vector<8x16xbf16> to vector<8x16xf32>
    %cst = arith.constant dense<0.000000e+00> : vector<8xf32>
    %2 = vector.multi_reduction <add>, %1, %cst [1] : vector<8x16xf32> to vector<8xf32>
    %3 = vector.shape_cast %2 : vector<8xf32> to vector<8x1xf32>
    %cst_1 = arith.constant 1.600000e+01 : f32
    %4 = vector.broadcast %cst_1 : f32 to vector<8x1xf32>
    %5 = arith.divf %3, %4 : vector<8x1xf32>
    %6 = vector.broadcast %5 : vector<8x1xf32> to vector<8x16xf32>
    %7 = arith.subf %1, %6 : vector<8x16xf32>
    %8 = arith.mulf %7, %7 : vector<8x16xf32>
    %cst_2 = arith.constant dense<0.000000e+00> : vector<8xf32>
    %9 = vector.multi_reduction <add>, %8, %cst_2 [1] : vector<8x16xf32> to vector<8xf32>
    %10 = vector.shape_cast %9 : vector<8xf32> to vector<8x1xf32>
    %cst_3 = arith.constant 1.600000e+01 : f32
    %11 = vector.broadcast %cst_3 : f32 to vector<8x1xf32>
    %12 = arith.divf %10, %11 : vector<8x1xf32>
    %cst_4 = arith.constant 9.99999974E-6 : f32
    %13 = vector.broadcast %cst_4 : f32 to vector<8x1xf32>
    %14 = arith.addf %12, %13 : vector<8x1xf32>
    %15 = math.rsqrt %14 : vector<8x1xf32>
    %16 = vector.broadcast %15 : vector<8x1xf32> to vector<8x16xf32>
    %17 = arith.mulf %7, %16 : vector<8x16xf32>
    %c0_5 = arith.constant 0 : index
    %c0_6 = arith.constant 0 : index
    %18 = vector.load %arg2[%c0_5, %c0_6] : memref<1x16xf32, #tpu.memory_space<vmem>>, vector<1x16xf32>
    %19 = vector.broadcast %18 : vector<1x16xf32> to vector<8x16xf32>
    %20 = arith.mulf %17, %19 : vector<8x16xf32>
    %c0_7 = arith.constant 0 : index
    %c0_8 = arith.constant 0 : index
    %21 = vector.load %arg3[%c0_7, %c0_8] : memref<1x16xf32, #tpu.memory_space<vmem>>, vector<1x16xf32>
    %22 = vector.broadcast %21 : vector<1x16xf32> to vector<8x16xf32>
    %23 = arith.addf %20, %22 : vector<8x16xf32>
    %24 = arith.truncf %23 : vector<8x16xf32> to vector<8x16xbf16>
    %c0_9 = arith.constant 0 : index
    %c0_10 = arith.constant 0 : index
    %25 = vector.load %arg4[%c0_9, %c0_10] : memref<8x16xbf16, #tpu.memory_space<vmem>>, vector<8x16xbf16>
    tpu.vector_store %arg4[%c0_9, %c0_10], %24 {strides = array<i32>} : memref<8x16xbf16, #tpu.memory_space<vmem>>, vector<8x16xbf16>,
    return
  }
  func.func @transform_0(%arg0: i32) -> (i32, i32) {
    %c0_i32 = arith.constant 0 : i32
    %c0_i32_0 = arith.constant 0 : i32
    return %arg0, %c0_i32 : i32, i32
  }
  func.func @transform_1(%arg0: i32) -> (i32, i32) {
    %c0_i32 = arith.constant 0 : i32
    %c0_i32_0 = arith.constant 0 : i32
    %c0_i32_1 = arith.constant 0 : i32
    return %c0_i32, %c0_i32_0 : i32, i32
  }
  func.func @transform_2(%arg0: i32) -> (i32, i32) {
    %c0_i32 = arith.constant 0 : i32
    %c0_i32_0 = arith.constant 0 : i32
    %c0_i32_1 = arith.constant 0 : i32
    return %c0_i32, %c0_i32_0 : i32, i32
  }
  func.func @transform_3(%arg0: i32) -> (i32, i32) {
    %c0_i32 = arith.constant 0 : i32
    %c0_i32_0 = arith.constant 0 : i32
    return %arg0, %c0_i32 : i32, i32
  }
}

module attributes {stable_mosaic.version = 11 : i64} {
  func.func @_matmul_bias_kernel(%arg0: i32, %arg1: i32, %arg2: i32, %arg3: memref<8x128xbf16, #tpu.memory_space<vmem>>, %arg4: memref<128x128xbf16, #tpu.memory_space<vmem>>, %arg5: memref<1x128xf32, #tpu.memory_space<vmem>>, %arg6: memref<8x128xf32, #tpu.memory_space<vmem>>, %arg7: memref<8x128xf32, #tpu.memory_space<vmem>>) attributes {dimension_semantics = [#tpu.dimension_semantics<parallel>, #tpu.dimension_semantics<parallel>, #tpu.dimension_semantics<arbitrary>], iteration_bounds = array<i64: 1, 3, 1>, scalar_prefetch = 0 : i64, scratch_operands = 1 : i64, tpu.core_type = #tpu.core_type<tc>, window_params = [{transform_indices = @transform_0, window_bounds = array<i64: 8, 128>}, {transform_indices = @transform_1, window_bounds = array<i64: 128, 128>}, {transform_indices = @transform_2, window_bounds = array<i64: 1, 128>}, {transform_indices = @transform_3, window_bounds = array<i64: 8, 128>}]} {
    %c0_i32 = arith.constant 0 : i32
    %0 = arith.cmpi eq, %arg2, %c0_i32 : i32
    %1 = arith.extui %0 : i1 to i32
    %c0_i32_0 = arith.constant 0 : i32
    %2 = arith.cmpi ne, %1, %c0_i32_0 : i32
    scf.if %2 {
      %cst_10 = arith.constant 0.000000e+00 : f32
      %12 = vector.broadcast %cst_10 : f32 to vector<8x128xf32>
      %c0_11 = arith.constant 0 : index
      %c0_12 = arith.constant 0 : index
      %13 = vector.load %arg7[%c0_11, %c0_12] : memref<8x128xf32, #tpu.memory_space<vmem>>, vector<8x128xf32>
      tpu.vector_store %arg7[%c0_11, %c0_12], %12 {strides = array<i32>} : memref<8x128xf32, #tpu.memory_space<vmem>>, vector<8x128xf32>,
    } else {
    }
    %c0 = arith.constant 0 : index
    %c0_1 = arith.constant 0 : index
    %3 = vector.load %arg7[%c0, %c0_1] : memref<8x128xf32, #tpu.memory_space<vmem>>, vector<8x128xf32>
    %c0_2 = arith.constant 0 : index
    %c0_3 = arith.constant 0 : index
    %4 = vector.load %arg3[%c0_2, %c0_3] : memref<8x128xbf16, #tpu.memory_space<vmem>>, vector<8x128xbf16>
    %c0_4 = arith.constant 0 : index
    %c0_5 = arith.constant 0 : index
    %5 = vector.load %arg4[%c0_4, %c0_5] : memref<128x128xbf16, #tpu.memory_space<vmem>>, vector<128x128xbf16>
    %cst = arith.constant dense<0.000000e+00> : vector<8x128xf32>
    %6 = tpu.matmul %4, %5, %cst {dimension_numbers = #tpu.dot_dimension_numbers<[1], [0], [0], [1], [0, 0, 1, 1], [], []>} : vector<8x128xbf16>, vector<128x128xbf16>, vector<8x128xf32> -> vector<8x128xf32>
    %7 = arith.addf %3, %6 : vector<8x128xf32>
    %c0_6 = arith.constant 0 : index
    %c0_7 = arith.constant 0 : index
    %8 = vector.load %arg7[%c0_6, %c0_7] : memref<8x128xf32, #tpu.memory_space<vmem>>, vector<8x128xf32>
    tpu.vector_store %arg7[%c0_6, %c0_7], %7 {strides = array<i32>} : memref<8x128xf32, #tpu.memory_space<vmem>>, vector<8x128xf32>,
    %c0_i32_8 = arith.constant 0 : i32
    %9 = arith.cmpi eq, %arg2, %c0_i32_8 : i32
    %10 = arith.extui %9 : i1 to i32
    %c0_i32_9 = arith.constant 0 : i32
    %11 = arith.cmpi ne, %10, %c0_i32_9 : i32
    scf.if %11 {
      %c0_10 = arith.constant 0 : index
      %c0_11 = arith.constant 0 : index
      %12 = vector.load %arg7[%c0_10, %c0_11] : memref<8x128xf32, #tpu.memory_space<vmem>>, vector<8x128xf32>
      %c0_12 = arith.constant 0 : index
      %c0_13 = arith.constant 0 : index
      %13 = vector.load %arg5[%c0_12, %c0_13] : memref<1x128xf32, #tpu.memory_space<vmem>>, vector<1x128xf32>
      %14 = vector.broadcast %13 : vector<1x128xf32> to vector<8x128xf32>
      %15 = arith.addf %12, %14 : vector<8x128xf32>
      %c0_14 = arith.constant 0 : index
      %c0_15 = arith.constant 0 : index
      %16 = vector.load %arg6[%c0_14, %c0_15] : memref<8x128xf32, #tpu.memory_space<vmem>>, vector<8x128xf32>
      tpu.vector_store %arg6[%c0_14, %c0_15], %15 {strides = array<i32>} : memref<8x128xf32, #tpu.memory_space<vmem>>, vector<8x128xf32>,
    } else {
    }
    return
  }
  func.func @transform_0(%arg0: i32, %arg1: i32, %arg2: i32) -> (i32, i32) {
    %c0_i32 = arith.constant 0 : i32
    return %arg0, %arg2 : i32, i32
  }
  func.func @transform_1(%arg0: i32, %arg1: i32, %arg2: i32) -> (i32, i32) {
    %c0_i32 = arith.constant 0 : i32
    return %arg2, %arg1 : i32, i32
  }
  func.func @transform_2(%arg0: i32, %arg1: i32, %arg2: i32) -> (i32, i32) {
    %c0_i32 = arith.constant 0 : i32
    %c0_i32_0 = arith.constant 0 : i32
    return %c0_i32, %arg1 : i32, i32
  }
  func.func @transform_3(%arg0: i32, %arg1: i32, %arg2: i32) -> (i32, i32) {
    %c0_i32 = arith.constant 0 : i32
    return %arg0, %arg1 : i32, i32
  }
}

module attributes {stable_mosaic.version = 11 : i64} {
  func.func @_layernorm_kernel(%arg0: i32, %arg1: memref<8x32xf32, #tpu.memory_space<vmem>>, %arg2: memref<1x32xf32, #tpu.memory_space<vmem>>, %arg3: memref<1x32xf32, #tpu.memory_space<vmem>>, %arg4: memref<8x32xbf16, #tpu.memory_space<vmem>>) attributes {dimension_semantics = [#tpu.dimension_semantics<parallel>], iteration_bounds = array<i64: 1>, scalar_prefetch = 0 : i64, scratch_operands = 0 : i64, tpu.core_type = #tpu.core_type<tc>, window_params = [{transform_indices = @transform_0, window_bounds = array<i64: 8, 32>}, {pipeline_mode = #tpu.pipeline_mode<synchronous>, transform_indices = @transform_1, window_bounds = array<i64: 1, 32>}, {pipeline_mode = #tpu.pipeline_mode<synchronous>, transform_indices = @transform_2, window_bounds = array<i64: 1, 32>}, {transform_indices = @transform_3, window_bounds = array<i64: 8, 32>}]} {
    %c0 = arith.constant 0 : index
    %c0_0 = arith.constant 0 : index
    %0 = vector.load %arg1[%c0, %c0_0] : memref<8x32xf32, #tpu.memory_space<vmem>>, vector<8x32xf32>
    %cst = arith.constant dense<0.000000e+00> : vector<8xf32>
    %1 = vector.multi_reduction <add>, %0, %cst [1] : vector<8x32xf32> to vector<8xf32>
    %2 = vector.shape_cast %1 : vector<8xf32> to vector<8x1xf32>
    %cst_1 = arith.constant 3.200000e+01 : f32
    %3 = vector.broadcast %cst_1 : f32 to vector<8x1xf32>
    %4 = arith.divf %2, %3 : vector<8x1xf32>
    %5 = vector.broadcast %4 : vector<8x1xf32> to vector<8x32xf32>
    %6 = arith.subf %0, %5 : vector<8x32xf32>
    %7 = arith.mulf %6, %6 : vector<8x32xf32>
    %cst_2 = arith.constant dense<0.000000e+00> : vector<8xf32>
    %8 = vector.multi_reduction <add>, %7, %cst_2 [1] : vector<8x32xf32> to vector<8xf32>
    %9 = vector.shape_cast %8 : vector<8xf32> to vector<8x1xf32>
    %cst_3 = arith.constant 3.200000e+01 : f32
    %10 = vector.broadcast %cst_3 : f32 to vector<8x1xf32>
    %11 = arith.divf %9, %10 : vector<8x1xf32>
    %cst_4 = arith.constant 9.99999974E-6 : f32
    %12 = vector.broadcast %cst_4 : f32 to vector<8x1xf32>
    %13 = arith.addf %11, %12 : vector<8x1xf32>
    %14 = math.rsqrt %13 : vector<8x1xf32>
    %15 = vector.broadcast %14 : vector<8x1xf32> to vector<8x32xf32>
    %16 = arith.mulf %6, %15 : vector<8x32xf32>
    %c0_5 = arith.constant 0 : index
    %c0_6 = arith.constant 0 : index
    %17 = vector.load %arg2[%c0_5, %c0_6] : memref<1x32xf32, #tpu.memory_space<vmem>>, vector<1x32xf32>
    %18 = vector.broadcast %17 : vector<1x32xf32> to vector<8x32xf32>
    %19 = arith.mulf %16, %18 : vector<8x32xf32>
    %c0_7 = arith.constant 0 : index
    %c0_8 = arith.constant 0 : index
    %20 = vector.load %arg3[%c0_7, %c0_8] : memref<1x32xf32, #tpu.memory_space<vmem>>, vector<1x32xf32>
    %21 = vector.broadcast %20 : vector<1x32xf32> to vector<8x32xf32>
    %22 = arith.addf %19, %21 : vector<8x32xf32>
    %23 = arith.truncf %22 : vector<8x32xf32> to vector<8x32xbf16>
    %c0_9 = arith.constant 0 : index
    %c0_10 = arith.constant 0 : index
    %24 = vector.load %arg4[%c0_9, %c0_10] : memref<8x32xbf16, #tpu.memory_space<vmem>>, vector<8x32xbf16>
    tpu.vector_store %arg4[%c0_9, %c0_10], %23 {strides = array<i32>} : memref<8x32xbf16, #tpu.memory_space<vmem>>, vector<8x32xbf16>,
    return
  }
  func.func @transform_0(%arg0: i32) -> (i32, i32) {
    %c0_i32 = arith.constant 0 : i32
    %c0_i32_0 = arith.constant 0 : i32
    return %arg0, %c0_i32 : i32, i32
  }
  func.func @transform_1(%arg0: i32) -> (i32, i32) {
    %c0_i32 = arith.constant 0 : i32
    %c0_i32_0 = arith.constant 0 : i32
    %c0_i32_1 = arith.constant 0 : i32
    return %c0_i32, %c0_i32_0 : i32, i32
  }
  func.func @transform_2(%arg0: i32) -> (i32, i32) {
    %c0_i32 = arith.constant 0 : i32
    %c0_i32_0 = arith.constant 0 : i32
    %c0_i32_1 = arith.constant 0 : i32
    return %c0_i32, %c0_i32_0 : i32, i32
  }
  func.func @transform_3(%arg0: i32) -> (i32, i32) {
    %c0_i32 = arith.constant 0 : i32
    %c0_i32_0 = arith.constant 0 : i32
    return %arg0, %c0_i32 : i32, i32
  }
}

module attributes {stable_mosaic.version = 11 : i64} {
  func.func @_matmul_bias_kernel(%arg0: i32, %arg1: i32, %arg2: i32, %arg3: memref<8x128xbf16, #tpu.memory_space<vmem>>, %arg4: memref<128x128xbf16, #tpu.memory_space<vmem>>, %arg5: memref<1x128xf32, #tpu.memory_space<vmem>>, %arg6: memref<8x128xf32, #tpu.memory_space<vmem>>, %arg7: memref<8x128xf32, #tpu.memory_space<vmem>>) attributes {dimension_semantics = [#tpu.dimension_semantics<parallel>, #tpu.dimension_semantics<parallel>, #tpu.dimension_semantics<arbitrary>], iteration_bounds = array<i64: 1, 1, 1>, scalar_prefetch = 0 : i64, scratch_operands = 1 : i64, tpu.core_type = #tpu.core_type<tc>, window_params = [{transform_indices = @transform_0, window_bounds = array<i64: 8, 128>}, {transform_indices = @transform_1, window_bounds = array<i64: 128, 128>}, {transform_indices = @transform_2, window_bounds = array<i64: 1, 128>}, {transform_indices = @transform_3, window_bounds = array<i64: 8, 128>}]} {
    %c0_i32 = arith.constant 0 : i32
    %0 = arith.cmpi eq, %arg2, %c0_i32 : i32
    %1 = arith.extui %0 : i1 to i32
    %c0_i32_0 = arith.constant 0 : i32
    %2 = arith.cmpi ne, %1, %c0_i32_0 : i32
    scf.if %2 {
      %cst_10 = arith.constant 0.000000e+00 : f32
      %12 = vector.broadcast %cst_10 : f32 to vector<8x128xf32>
      %c0_11 = arith.constant 0 : index
      %c0_12 = arith.constant 0 : index
      %13 = vector.load %arg7[%c0_11, %c0_12] : memref<8x128xf32, #tpu.memory_space<vmem>>, vector<8x128xf32>
      tpu.vector_store %arg7[%c0_11, %c0_12], %12 {strides = array<i32>} : memref<8x128xf32, #tpu.memory_space<vmem>>, vector<8x128xf32>,
    } else {
    }
    %c0 = arith.constant 0 : index
    %c0_1 = arith.constant 0 : index
    %3 = vector.load %arg7[%c0, %c0_1] : memref<8x128xf32, #tpu.memory_space<vmem>>, vector<8x128xf32>
    %c0_2 = arith.constant 0 : index
    %c0_3 = arith.constant 0 : index
    %4 = vector.load %arg3[%c0_2, %c0_3] : memref<8x128xbf16, #tpu.memory_space<vmem>>, vector<8x128xbf16>
    %c0_4 = arith.constant 0 : index
    %c0_5 = arith.constant 0 : index
    %5 = vector.load %arg4[%c0_4, %c0_5] : memref<128x128xbf16, #tpu.memory_space<vmem>>, vector<128x128xbf16>
    %cst = arith.constant dense<0.000000e+00> : vector<8x128xf32>
    %6 = tpu.matmul %4, %5, %cst {dimension_numbers = #tpu.dot_dimension_numbers<[1], [0], [0], [1], [0, 0, 1, 1], [], []>} : vector<8x128xbf16>, vector<128x128xbf16>, vector<8x128xf32> -> vector<8x128xf32>
    %7 = arith.addf %3, %6 : vector<8x128xf32>
    %c0_6 = arith.constant 0 : index
    %c0_7 = arith.constant 0 : index
    %8 = vector.load %arg7[%c0_6, %c0_7] : memref<8x128xf32, #tpu.memory_space<vmem>>, vector<8x128xf32>
    tpu.vector_store %arg7[%c0_6, %c0_7], %7 {strides = array<i32>} : memref<8x128xf32, #tpu.memory_space<vmem>>, vector<8x128xf32>,
    %c0_i32_8 = arith.constant 0 : i32
    %9 = arith.cmpi eq, %arg2, %c0_i32_8 : i32
    %10 = arith.extui %9 : i1 to i32
    %c0_i32_9 = arith.constant 0 : i32
    %11 = arith.cmpi ne, %10, %c0_i32_9 : i32
    scf.if %11 {
      %c0_10 = arith.constant 0 : index
      %c0_11 = arith.constant 0 : index
      %12 = vector.load %arg7[%c0_10, %c0_11] : memref<8x128xf32, #tpu.memory_space<vmem>>, vector<8x128xf32>
      %c0_12 = arith.constant 0 : index
      %c0_13 = arith.constant 0 : index
      %13 = vector.load %arg5[%c0_12, %c0_13] : memref<1x128xf32, #tpu.memory_space<vmem>>, vector<1x128xf32>
      %14 = vector.broadcast %13 : vector<1x128xf32> to vector<8x128xf32>
      %15 = arith.addf %12, %14 : vector<8x128xf32>
      %c0_14 = arith.constant 0 : index
      %c0_15 = arith.constant 0 : index
      %16 = vector.load %arg6[%c0_14, %c0_15] : memref<8x128xf32, #tpu.memory_space<vmem>>, vector<8x128xf32>
      tpu.vector_store %arg6[%c0_14, %c0_15], %15 {strides = array<i32>} : memref<8x128xf32, #tpu.memory_space<vmem>>, vector<8x128xf32>,
    } else {
    }
    return
  }
  func.func @transform_0(%arg0: i32, %arg1: i32, %arg2: i32) -> (i32, i32) {
    %c0_i32 = arith.constant 0 : i32
    return %arg0, %arg2 : i32, i32
  }
  func.func @transform_1(%arg0: i32, %arg1: i32, %arg2: i32) -> (i32, i32) {
    %c0_i32 = arith.constant 0 : i32
    return %arg2, %arg1 : i32, i32
  }
  func.func @transform_2(%arg0: i32, %arg1: i32, %arg2: i32) -> (i32, i32) {
    %c0_i32 = arith.constant 0 : i32
    %c0_i32_0 = arith.constant 0 : i32
    return %c0_i32, %arg1 : i32, i32
  }
  func.func @transform_3(%arg0: i32, %arg1: i32, %arg2: i32) -> (i32, i32) {
    %c0_i32 = arith.constant 0 : i32
    return %arg0, %arg1 : i32, i32
  }
}

</mosaic_0001>

<bundles_post_ra>
// kernel: _lambda_.28
= control target key start
LH: loop header
LB: loop body
LE: loop exit
PB: predicated region body
PF: predicated region fallthrough
CT: control target
= control target key end

     0   :  { %v467_v1 = vmov 0.0   ;;  %vm468_vm0 = vmmov 0   ;;  %s576_s1 = inlined_call_operand.vmem [shape: bf16[384,128], index: 1, kind: input, shape index: {}]   ;;  %s577_s0 = inlined_call_operand.vmem [shape: bf16[16,384], index: 0, kind: input, shape index: {}]   ;;  %s578_s2 = inlined_call_operand.vmem [shape: f32[1,128], index: 2, kind: input, shape index: {}]   ;;  %s579_s3 = inlined_call_operand.vmem [shape: bf16[16,128], index: 3, kind: output, shape index: {}]  }
   0x1   :  { %v439_v0 = vld [vmem:[%s576_s1 + $0x40] sm:$0xff]   ;;  %417 = vmatprep.subr.bf16.mxu1 %v467_v1  ;;  %433 = vmatprep.mubr.msk.bf16.mxu1 %vm468_vm0, %v467_v1  ;;  %v442_v4 = vld [vmem:[%s576_s1 + $0x48] sm:$0xff]   ;;  %v445_v7 = vld [vmem:[%s576_s1 + $0x50] sm:$0xff]  }
   0x2   :  { %v440_v2 = vld [vmem:[%s576_s1] sm:$0xff]   ;;  %386 = vmatprep.subr.bf16.mxu0 %v439_v0  ;;  %v443_v5 = vld [vmem:[%s576_s1 + $0x8] sm:$0xff]   ;;  %v446_v8 = vld [vmem:[%s576_s1 + $0x10] sm:$0xff]  }
   0x3   :  { %v441_v3 = vld [vmem:[%s576_s1 + $0x80] sm:$0xff]   ;;  %387 = vmatpush3.bf16.msra.mxu0 %v440_v2  ;;  %v444_v6 = vld [vmem:[%s576_s1 + $0x88] sm:$0xff]   ;;  %v447_v9 = vld [vmem:[%s576_s1 + $0x90] sm:$0xff]  }
   0x4   :  { %418 = vmatpush3.bf16.msra.mxu1 %v441_v3  ;;  %388 = vmatprep.subr.bf16.mxu0 %v442_v4  ;;  %v448_v10 = vld [vmem:[%s576_s1 + $0x58] sm:$0xff]   ;;  %v451_v13 = vld [vmem:[%s576_s1 + $0x60] sm:$0xff]   ;;  %v454_v16 = vld [vmem:[%s576_s1 + $0x68] sm:$0xff]  }
   0x5   :  { %419 = vmatprep.subr.bf16.mxu1 %v467_v1  ;;  %v449_v11 = vld [vmem:[%s576_s1 + $0x18] sm:$0xff]   ;;  %v452_v14 = vld [vmem:[%s576_s1 + $0x20] sm:$0xff]   ;;  %v455_v17 = vld [vmem:[%s576_s1 + $0x28] sm:$0xff]  }
   0x6   :  { %v450_v12 = vld [vmem:[%s576_s1 + $0x98] sm:$0xff]   ;;  %v453_v15 = vld [vmem:[%s576_s1 + $0xa0] sm:$0xff]   ;;  %v456_v18 = vld [vmem:[%s576_s1 + $0xa8] sm:$0xff]  }
   0x7   :  { %389 = vmatpush3.bf16.msra.mxu0 %v443_v5  ;;  %v457_v19 = vld [vmem:[%s576_s1 + $0x70] sm:$0xff]   ;;  %v460_v22 = vld [vmem:[%s576_s1 + $0x78] sm:$0xff]   ;;  %v463_v26 = vld [vmem:[%s577_s0] ss:$12 sps:$4 sm:$0xff]  }
   0x8   :  { %420 = vmatpush3.bf16.msra.mxu1 %v444_v6  ;;  %390 = vmatprep.subr.bf16.mxu0 %v445_v7  ;;  %v458_v20 = vld [vmem:[%s576_s1 + $0x30] sm:$0xff]   ;;  %v461_v24 = vld [vmem:[%s576_s1 + $0x38] sm:$0xff]   ;;  %v376_v39 = vld [vmem:[%s578_s2] ss:$0 sm:$0xff] }
   0x9   :  { %421 = vmatprep.subr.bf16.mxu1 %v467_v1  ;;  %v459_v21 = vld [vmem:[%s576_s1 + $0xb0] sm:$0xff]   ;;  %v462_v25 = vld [vmem:[%s576_s1 + $0xb8] sm:$0xff]  }
   0xa   :  { %v465_v23 = vld [vmem:[%s577_s0 + $0x4] ss:$12 sps:$4 sm:$0xff]   ;;  %v466_v27 = vld [vmem:[%s577_s0 + $0x8] ss:$12 sps:$4 sm:$0xff]  }
   0xb   :  { %391 = vmatpush3.bf16.msra.mxu0 %v446_v8  ;;  %267 = vmatprep.mubr.bf16.mxu0 %v465_v23 }
   0xc   :  { %422 = vmatpush3.bf16.msra.mxu1 %v447_v9  ;;  %392 = vmatprep.subr.bf16.mxu0 %v448_v10 }
   0xd   :  { %423 = vmatprep.subr.bf16.mxu1 %v467_v1 }
   0xf   :  { %393 = vmatpush3.bf16.msra.mxu0 %v449_v11 }
  0x10   :  { %424 = vmatpush3.bf16.msra.mxu1 %v450_v12  ;;  %394 = vmatprep.subr.bf16.mxu0 %v451_v13 }
  0x11   :  { %425 = vmatprep.subr.bf16.mxu1 %v467_v1 }
  0x13   :  { %395 = vmatpush3.bf16.msra.mxu0 %v452_v14 }
  0x14   :  { %426 = vmatpush3.bf16.msra.mxu1 %v453_v15  ;;  %396 = vmatprep.subr.bf16.mxu0 %v454_v16 }
  0x15   :  { %427 = vmatprep.subr.bf16.mxu1 %v467_v1 }
  0x17   :  { %397 = vmatpush3.bf16.msra.mxu0 %v455_v17 }
  0x18   :  { %428 = vmatpush3.bf16.msra.mxu1 %v456_v18  ;;  %398 = vmatprep.subr.bf16.mxu0 %v457_v19 }
  0x19   :  { %429 = vmatprep.subr.bf16.mxu1 %v467_v1 }
  0x1b   :  { %399 = vmatpush3.bf16.msra.mxu0 %v458_v20 }
  0x1c   :  { %430 = vmatpush3.bf16.msra.mxu1 %v459_v21  ;;  %400 = vmatprep.subr.bf16.mxu0 %v460_v22 }
  0x1d   :  { %431 = vmatprep.subr.bf16.mxu1 %v467_v1 }
  0x1f   :  { %401 = vmatpush3.bf16.msra.mxu0 %v461_v24 }
  0x20   :  { %432 = vmatpush3.bf16.msra.mxu1 %v462_v25 }
  0x22   :  { %268 = vmatmul.mubr.bf16.vlgmr.msra.gmra.mrb[0].mxu0 %v463_v26 }
  0x23   :  { %434 = vmatmul.mubr.bf16.vlgmr.msra.gmra.mrb[0].mxu1 %v466_v27 }
  0xf5   :  { %v402_v28 = vpop.f32.mrb[0].mxu0 }
  0xf6   :  { %v310_v29 = vpop.f32.mrb[0].mxu1  ;;  %v403_v30 = vpop.f32.mrb[1].mxu0 }
  0xf7   :  { %v404_v31 = vadd.f32 %v403_v30, %v402_v28  ;;  %v435_v32 = vpop.f32.mrb[1].mxu1  ;;  %v405_v33 = vpop.f32.mrb[2].mxu0 }
  0xf8   :  { %v313_v34 = vpop.f32.mrb[2].mxu1  ;;  %v406_v35 = vpop.f32.mrb[3].mxu0 }
  0xf9   :  { %v311_v36 = vadd.f32 %v404_v31, %v310_v29  ;;  %v407_v37 = vadd.f32 %v406_v35, %v405_v33  ;;  %v436_v38 = vpop.f32.mrb[3].mxu1 }
  0xfb   :  { %v314_v40 = vadd.f32 %v407_v37, %v313_v34  ;;  %v333_v41 = vadd.f32 %v376_v39, %v311_v36 }
  0xfd   :  { %v334_v42 = vadd.f32 %v376_v39, %v314_v40 }
  0xff   :  { %v384_v43 = vpack.c.bf16 %v334_v42, %v333_v41 }
 0x101   :  { %385 = vst [vmem:[%s579_s3] sm:$0xff] %v384_v43  }

// kernel: _lambda_.30
= control target key start
LH: loop header
LB: loop body
LE: loop exit
PB: predicated region body
PF: predicated region fallthrough
CT: control target
= control target key end

     0   :  { %v182_v0 = vmov 0.0   ;;  %vm183_vm0 = vmmov 0   ;;  %s229_s1 = inlined_call_operand.vmem [shape: bf16[128,128], index: 1, kind: input, shape index: {}]   ;;  %s230_s0 = inlined_call_operand.vmem [shape: bf16[8,128], index: 0, kind: input, shape index: {}]   ;;  %s231_s2 = inlined_call_operand.vmem [shape: bf16[8,128], index: 2, kind: output, shape index: {}]  }
   0x1   :  { %152 = vmatprep.subr.bf16.mxu0 %v182_v0  ;;  %v174_v1 = vld [vmem:[%s229_s1] sm:$0xff]   ;;  %168 = vmatprep.mubr.msk.bf16.mxu0 %vm183_vm0, %v182_v0  ;;  %v175_v2 = vld [vmem:[%s229_s1 + $0x8] sm:$0xff]   ;;  %v176_v3 = vld [vmem:[%s229_s1 + $0x10] sm:$0xff]  }
   0x2   :  { %153 = vmatpush3.bf16.msra.mxu0 %v174_v1  ;;  %v177_v4 = vld [vmem:[%s229_s1 + $0x18] sm:$0xff]   ;;  %v178_v5 = vld [vmem:[%s229_s1 + $0x20] sm:$0xff]   ;;  %v179_v6 = vld [vmem:[%s229_s1 + $0x28] sm:$0xff]  }
   0x3   :  { %154 = vmatprep.subr.bf16.mxu0 %v182_v0  ;;  %v180_v7 = vld [vmem:[%s229_s1 + $0x30] sm:$0xff]   ;;  %v181_v8 = vld [vmem:[%s229_s1 + $0x38] sm:$0xff]   ;;  %v18_v9 = vld [vmem:[%s230_s0] sm:$0xf] }
   0x6   :  { %155 = vmatpush3.bf16.msra.mxu0 %v175_v2 }
   0x7   :  { %156 = vmatprep.subr.bf16.mxu0 %v182_v0 }
   0xa   :  { %157 = vmatpush3.bf16.msra.mxu0 %v176_v3 }
   0xb   :  { %158 = vmatprep.subr.bf16.mxu0 %v182_v0 }
   0xe   :  { %159 = vmatpush3.bf16.msra.mxu0 %v177_v4 }
   0xf   :  { %160 = vmatprep.subr.bf16.mxu0 %v182_v0 }
  0x12   :  { %161 = vmatpush3.bf16.msra.mxu0 %v178_v5 }
  0x13   :  { %162 = vmatprep.subr.bf16.mxu0 %v182_v0 }
  0x16   :  { %163 = vmatpush3.bf16.msra.mxu0 %v179_v6 }
  0x17   :  { %164 = vmatprep.subr.bf16.mxu0 %v182_v0 }
  0x1a   :  { %165 = vmatpush3.bf16.msra.mxu0 %v180_v7 }
  0x1b   :  { %166 = vmatprep.subr.bf16.mxu0 %v182_v0 }
  0x1e   :  { %167 = vmatpush3.bf16.msra.mxu0 %v181_v8 }
  0x21   :  { %169 = vmatmul.mubr.bf16.vlgmr.msra.gmra.mrb[0].mxu0 %v18_v9 }
  0xf4   :  { %v117_v10 = vpop.f32.mrb[0].mxu0 }
  0xf5   :  { %v129_v11 = vpack.c.bf16 %v117_v10, %v117_v10  ;;  %v170_v12 = vpop.f32.mrb[1].mxu0 }
  0xf6   :  { %v120_v13 = vpop.f32.mrb[2].mxu0 }
  0xf7   :  { %130 = vst [vmem:[%s231_s2] sm:$0xf] %v129_v11  ;;  %v171_v14 = vpop.f32.mrb[3].mxu0 }

// kernel: _lambda_.29
= control target key start
LH: loop header
LB: loop body
LE: loop exit
PB: predicated region body
PF: predicated region fallthrough
CT: control target
= control target key end

     0   :  { %vm16_vm0 = vcmask 261120   ;;  %vm48_vm1 = vcmask 257024   ;;  %s90_s0 = inlined_call_operand.vmem [shape: bf16[8,32], index: 0, kind: input, shape index: {}]   ;;  %s91_s1 = inlined_call_operand.vmem [shape: f32[1,32], index: 1, kind: input, shape index: {}]   ;;  %s92_s2 = inlined_call_operand.vmem [shape: f32[1,32], index: 2, kind: input, shape index: {}]   ;;  %s93_s3 = inlined_call_operand.vmem [shape: bf16[8,32], index: 3, kind: output, shape index: {}]  }
   0x1   :  { %v14_v0 = vld [vmem:[%s90_s0] sm:$0xf] }
   0x2   :  { %v15_v1 = vunpack.c.l.bf16 %v14_v0  ;;  %v54_v12 = vld [vmem:[%s91_s1] ss:$0 sm:$0xff] }
   0x3   :  { %v55_v14 = vld [vmem:[%s92_s2] ss:$0 sm:$0xff] }
   0x4   :  { %v17_v2 = vsel %vm16_vm0, %v15_v1, 0.0 }
   0x5   :  { %18 = vadd.xlane.f32.xlu0 %v17_v2 }
  0x92   :  { %v19_v3 = vpop.xlane.xlu0 %18 }
  0x93   :  { %v21_v4 = vmul.f32 0.03125, %v19_v3 }
  0x95   :  { %v22_v5 = vsub.f32 %v15_v1, %v21_v4 }
  0x97   :  { %v23_v6 = vmul.f32 %v22_v5, %v22_v5 }
  0x99   :  { %v24_v7 = vsel %vm16_vm0, %v23_v6, 0.0 }
  0x9a   :  { %25 = vadd.xlane.f32.xlu0 %v24_v7 }
 0x127   :  { %v26_v8 = vpop.xlane.xlu0 %25 }
 0x128   :  { %v27_v9 = vmul.f32 0.03125, %v26_v8 }
 0x12a   :  { %v28_v10 = vadd.f32 1e-05, %v27_v9 }
 0x12c   :  { %56 = vrsqrt.f32 %v28_v10 }
 0x136   :  { %v57_v11 = vpop.eup %56 }
 0x137   :  { %v30_v13 = vmul.f32 %v57_v11, %v22_v5 }
 0x139   :  { %v38_v15 = vmul.f32 %v54_v12, %v30_v13 }
 0x13b   :  { %v46_v16 = vadd.f32 %v55_v14, %v38_v15 }
 0x13d   :  { %v47_v17 = vpack.c.bf16 %v46_v16, %v46_v16 }
 0x13f   :  { %49 = vst.msk [vmem:[%s93_s3] sm:$0xf] %vm48_vm1, %v47_v17 }

// kernel: _lambda_.32
= control target key start
LH: loop header
LB: loop body
LE: loop exit
PB: predicated region body
PF: predicated region fallthrough
CT: control target
= control target key end

     0   :  { %v194_v0 = vmov 0.0   ;;  %vm195_vm0 = vmmov 0   ;;  %s249_s1 = inlined_call_operand.vmem [shape: bf16[128,128], index: 1, kind: input, shape index: {}]   ;;  %s250_s0 = inlined_call_operand.vmem [shape: bf16[8,128], index: 0, kind: input, shape index: {}]   ;;  %s251_s2 = inlined_call_operand.vmem [shape: f32[1,128], index: 2, kind: input, shape index: {}]   ;;  %s252_s3 = inlined_call_operand.vmem [shape: bf16[8,128], index: 3, kind: output, shape index: {}]  }
   0x1   :  { %164 = vmatprep.subr.bf16.mxu0 %v194_v0  ;;  %v186_v1 = vld [vmem:[%s249_s1] sm:$0xff]   ;;  %180 = vmatprep.mubr.msk.bf16.mxu0 %vm195_vm0, %v194_v0  ;;  %v187_v2 = vld [vmem:[%s249_s1 + $0x8] sm:$0xff]   ;;  %v188_v3 = vld [vmem:[%s249_s1 + $0x10] sm:$0xff]  }
   0x2   :  { %165 = vmatpush3.bf16.msra.mxu0 %v186_v1  ;;  %v189_v4 = vld [vmem:[%s249_s1 + $0x18] sm:$0xff]   ;;  %v190_v5 = vld [vmem:[%s249_s1 + $0x20] sm:$0xff]   ;;  %v191_v6 = vld [vmem:[%s249_s1 + $0x28] sm:$0xff]  }
   0x3   :  { %166 = vmatprep.subr.bf16.mxu0 %v194_v0  ;;  %v192_v7 = vld [vmem:[%s249_s1 + $0x30] sm:$0xff]   ;;  %v193_v8 = vld [vmem:[%s249_s1 + $0x38] sm:$0xff]   ;;  %v21_v9 = vld [vmem:[%s250_s0] sm:$0xf] }
   0x4   :  { %v154_v10 = vld [vmem:[%s251_s2] ss:$0 sm:$0xff] }
   0x6   :  { %167 = vmatpush3.bf16.msra.mxu0 %v187_v2 }
   0x7   :  { %168 = vmatprep.subr.bf16.mxu0 %v194_v0 }
   0xa   :  { %169 = vmatpush3.bf16.msra.mxu0 %v188_v3 }
   0xb   :  { %170 = vmatprep.subr.bf16.mxu0 %v194_v0 }
   0xe   :  { %171 = vmatpush3.bf16.msra.mxu0 %v189_v4 }
   0xf   :  { %172 = vmatprep.subr.bf16.mxu0 %v194_v0 }
  0x12   :  { %173 = vmatpush3.bf16.msra.mxu0 %v190_v5 }
  0x13   :  { %174 = vmatprep.subr.bf16.mxu0 %v194_v0 }
  0x16   :  { %175 = vmatpush3.bf16.msra.mxu0 %v191_v6 }
  0x17   :  { %176 = vmatprep.subr.bf16.mxu0 %v194_v0 }
  0x1a   :  { %177 = vmatpush3.bf16.msra.mxu0 %v192_v7 }
  0x1b   :  { %178 = vmatprep.subr.bf16.mxu0 %v194_v0 }
  0x1e   :  { %179 = vmatpush3.bf16.msra.mxu0 %v193_v8 }
  0x21   :  { %181 = vmatmul.mubr.bf16.vlgmr.msra.gmra.mrb[0].mxu0 %v21_v9 }
  0xf4   :  { %v120_v11 = vpop.f32.mrb[0].mxu0 }
  0xf5   :  { %v139_v12 = vadd.f32 %v154_v10, %v120_v11  ;;  %v182_v13 = vpop.f32.mrb[1].mxu0 }
  0xf6   :  { %v123_v14 = vpop.f32.mrb[2].mxu0 }
  0xf7   :  { %v140_v15 = vpack.c.bf16 %v139_v12, %v139_v12  ;;  %v183_v16 = vpop.f32.mrb[3].mxu0 }
  0xf9   :  { %141 = vst [vmem:[%s252_s3] sm:$0xf] %v140_v15 }

// kernel: _lambda_.31
= control target key start
LH: loop header
LB: loop body
LE: loop exit
PB: predicated region body
PF: predicated region fallthrough
CT: control target
= control target key end

     0   :  { %s636_s12 = smov 0   ;;  %s638_s13 = smov 0   ;;  %s688_s0 = inlined_call_operand.vmem [shape: bf16[4,8,128], index: 0, kind: input, shape index: {}]   ;;  %s689_s1 = inlined_call_operand.vmem [shape: bf16[4,8,128], index: 1, kind: input, shape index: {}]   ;;  %s690_s2 = inlined_call_operand.vmem [shape: bf16[4,8,128], index: 2, kind: input, shape index: {}]   ;;  %s691_s3 = inlined_call_operand.vmem [shape: bf16[4,8,128], index: 3, kind: output, shape index: {}]  }
   0x1   :  { %s640_s14 = smov 0  }
   0x2 LB: > { %s32_s15 = sadd.s32 1, %s606_s13  ;;  %p528_p0 = scmp.ge.s32.totalorder %s610_s14, 1  ;;  %s610_s14 = sphi %s640_s14, %s13_s14   ;;  %s606_s13 = sphi %s638_s13, %s693_s13   ;;  %s602_s12 = sphi %s636_s12, %s692_s12  }
   0x3   : > { %p34_p1 = scmp.ge.s32.totalorder %s32_s15, 4  ;;  %p190_p2 = scmp.lt.s32.totalorder %s610_s14, 5 }
   0x5   : > { %s695_s15 = smov (%p34_p1, %s32_s15), 0  ;;  %p191_p3 = pnand %p528_p0, %p190_p2 }
   0x6   : > { %p232_p4 = scmp.lt.s32.totalorder (!%p191_p3), %s602_s12, 3  ;;  %v612_v0 = vmov (!%p191_p3), 0.0   ;;  %vm613_vm0 = vmmov (!%p191_p3), 0   ;;  %vm265_vm1 = vcmask (!%p191_p3), 7168   ;;  %v614_v3 = vmov (!%p191_p3), -inf  }
   0x7   : > { %194 = sbr.rel (%p191_p3) target bundleno = 825 (0x339), region = 32  ;;  %540 = vmatprep.subr.bf16.mxu0 (!%p191_p3), %v612_v0  ;;  %542 = vmatprep.mubr.msk.bf16.mxu0 (!%p191_p3), %vm613_vm0, %v612_v0  ;;  %266 = vst.msk [vmem:[#allocation2] sm:$0xff] (!%p191_p3), %vm265_vm1, %v614_v3  ;;  %267 = vst.msk [vmem:[#allocation3] sm:$0xff] (!%p191_p3), %vm265_vm1, %v612_v0  ;;  %v312_v4 = vlaneseq (!%p191_p3)  ;;  %vm320_vm3 = vcmask (!%p191_p3), 64512   ;;  %v615_v13 = vmov (!%p191_p3), 0   ;;  %vm356_vm4 = vcmask (!%p191_p3), 1043456  }
   0x8   : > { %546 = vmatprep.subr.bf16.mxu1 (!%p191_p3), %v612_v0  ;;  %548 = vmatprep.mubr.msk.bf16.mxu1 (!%p191_p3), %vm613_vm0, %v612_v0 }
   0x9   : > { %v313_v5 = vand.u32 (!%p191_p3), 127, %v312_v4  ;;  %580 = vset.pattern.permute.xlu0 (!%p191_p3), %v615_v13  ;;  %581 = vset.pattern.permute.xlu1 (!%p191_p3), %v615_v13 }
   0xb   : > { %vm317_vm2 = vcmp.lt.s32.totalorder (!%p191_p3), %v313_v5, 4 }
   0xe   : > { %s697_s12 = smov (!%p232_p4, %s602_s12), 3  ;;  %v319_v14 = vld [vmem:[#allocation2] sm:$0xff]  ;;  %v336_v28 = vld [vmem:[#allocation3] sm:$0xff] }
   0xf   : > { %s654_s16 = sshll.u32 %s697_s12, 2 }
  0x10   : > { %s245_s19 = scalar_lea.vmem %s689_s1, %s654_s16  ;;  %s238_s22 = scalar_lea.vmem %s688_s0, %s654_s16 }
  0x11   : > { %v270_v1 = vld [vmem:[%s245_s19] sm:$0xf]  ;;  %s252_s25 = scalar_lea.vmem %s690_s2, %s654_s16  ;;  %s259_s28 = scalar_lea.vmem %s691_s3, %s654_s16 }
  0x12   : > { %541 = vmatpush3.bf16.xpose.msra.mxu0 %v270_v1  ;;  %v269_v2 = vld [vmem:[%s238_s22] sm:$0xf] }
  0x13   : > { %v352_v18 = vld [vmem:[%s252_s25] sm:$0xf] }
  0x14   : > { %v358_v19 = vsel %vm356_vm4, %v352_v18, 0 }
  0x15   : > { %547 = vmatpush3.bf16.msra.mxu1 %v358_v19 }
  0x19   : > { %543 = vmatmul.mubr.bf16.vlgmr.msra.gmra.mrb[0].mxu0 %v269_v2 }
  0xec   : > { %v305_v6 = vpop.f32.mrb[0].mxu0 }
  0xed   : > { %v311_v7 = vmul.f32 0.25, %v305_v6  ;;  %v544_v8 = vpop.f32.mrb[1].mxu0 }
  0xee   : > { %v308_v9 = vpop.f32.mrb[2].mxu0 }
  0xef   : > { %v545_v10 = vpop.f32.mrb[3].mxu0  ;;  %v318_v11 = vsel %vm317_vm2, %v311_v7, -inf }
  0xf0   : > { %v321_v12 = vsel %vm320_vm3, %v318_v11, -inf }
  0xf1   : > { %322 = vmax.xlane.f32.xlu0 %v321_v12 }
 0x17e   : > { %v323_v15 = vpop.xlane.xlu0 %322 }
 0x17f   : > { %v324_v16 = vmax.f32 %v319_v14, %v323_v15 }
 0x181   : > { %v325_v17 = vsub.f32 %v319_v14, %v324_v16  ;;  %402 = vst.msk [vmem:[#allocation2] sm:$0xff] %vm265_vm1, %v324_v16  ;;  %330 = vperm.xlu0 %580, %v324_v16  }
 0x183   : > { %v326_v26 = vmul.f32 1.442695, %v325_v17 }
 0x200   : > { %v331_v20 = vpop.permute.xlu0 %330 }
 0x201   : > { %v333_v21 = vsub.f32 %v318_v11, %v331_v20 }
 0x203   : > { %v334_v22 = vmul.f32 1.442695, %v333_v21 }
 0x205   : > { %582 = vpow2.f32 %v334_v22 }
 0x206   : > { %584 = vpow2.f32 %v326_v26 }
 0x20f   : > { %v583_v23 = vpop.eup %582 }
 0x210   : > { %v338_v24 = vsel %vm320_vm3, %v583_v23, 0.0  ;;  %v351_v25 = vpack.c.bf16 %v583_v23, %v583_v23  ;;  %v585_v27 = vpop.eup %584 }
 0x211   : > { %339 = vadd.xlane.f32.xlu1 %v338_v24  ;;  %v337_v29 = vmul.f32 %v585_v27, %v336_v28 }
 0x212   : > { %549 = vmatmul.mubr.msk.bf16.vlgmr.msra.gmra.mrb[0].mxu1 %vm320_vm3, %v351_v25 }
 0x222   : > { %347 = vperm.xlu1 %581, %v585_v27  }
 0x29e   : > { %v340_v30 = vpop.xlane.xlu1 %339 }
 0x29f   : > { %v341_v31 = vadd.f32 %v340_v30, %v337_v29 }
 0x2a1   : > { %343 = vst.msk [vmem:[#allocation3] sm:$0xff] %vm265_vm1, %v341_v31 }
 0x2a2   : > { %v348_v38 = vpop.permute.xlu1 %347 }
 0x2a3   : > { %v350_v39 = vmul.f32 0.0, %v348_v38 }
 0x2a8   : > { %v407_v32 = vld [vmem:[#allocation3] sm:$0xff] }
 0x2a9   : > { %586 = vrcp.f32 %v407_v32 }
 0x2b3   : > { %v587_v33 = vpop.eup %586 }
 0x2b4   : > { %411 = vperm.xlu1 %581, %v587_v33  }
 0x2e5   : > { %v394_v34 = vpop.f32.mrb[0].mxu1 }
 0x2e6   : > { %v550_v35 = vpop.f32.mrb[1].mxu1  ;;  %v400_v40 = vadd.f32 %v394_v34, %v350_v39 }
 0x2e7   : > { %v397_v36 = vpop.f32.mrb[2].mxu1 }
 0x2e8   : > { %v551_v37 = vpop.f32.mrb[3].mxu1 }
 0x333   : > { %v412_v41 = vpop.permute.xlu1 %411 }
 0x334   : > { %v414_v42 = vmul.f32 %v412_v41, %v400_v40 }
 0x336   : > { %v415_v43 = vpack.c.bf16 %v414_v42, %v414_v42 }
 0x338   : > { %416 = vst [vmem:[%s259_s28] sm:$0xf] %v415_v43 }
 0x339 PF: > { %s13_s14 = sadd.s32 1, %s610_s14   ;;  %s692_s12 = smov %s606_s13 }
 0x33a   : > { %p10_p5 = scmp.ge.s32.totalorder %s13_s14, 6   ;;  %s693_s13 = smov %s695_s15 }
 0x33c   :  { %12 = sbr.rel (!%p10_p5) target bundleno = 2 (0x2), region = 76 }

// kernel: _lambda_.47
= control target key start
LH: loop header
LB: loop body
LE: loop exit
PB: predicated region body
PF: predicated region fallthrough
CT: control target
= control target key end

     0   :  { %vm18_vm0 = vcmask 130048   ;;  %vm72_vm1 = vcmask 125952   ;;  %s132_s0 = inlined_call_operand.vmem [shape: bf16[16,16], index: 0, kind: input, shape index: {}]   ;;  %s133_s1 = inlined_call_operand.vmem [shape: f32[1,16], index: 1, kind: input, shape index: {}]   ;;  %s134_s2 = inlined_call_operand.vmem [shape: f32[1,16], index: 2, kind: input, shape index: {}]   ;;  %s135_s3 = inlined_call_operand.vmem [shape: bf16[16,16], index: 3, kind: output, shape index: {}]  }
   0x1   :  { %v86_v0 = vld [vmem:[%s132_s0] sm:$0xff]  }
   0x2   :  { %v87_v1 = vunpack.c.l.bf16 %v86_v0  ;;  %v88_v2 = vunpack.c.h.bf16 %v86_v0  ;;  %v79_v22 = vld [vmem:[%s133_s1] ss:$0 sm:$0xff] }
   0x3   :  { %v80_v24 = vld [vmem:[%s134_s2] ss:$0 sm:$0xff] }
   0x4   :  { %v19_v3 = vsel %vm18_vm0, %v87_v1, 0.0  ;;  %v22_v4 = vsel %vm18_vm0, %v88_v2, 0.0 }
   0x5   :  { %20 = vadd.xlane.f32.xlu0 %v19_v3 }
   0x9   :  { %23 = vadd.xlane.f32.xlu0 %v22_v4 }
  0x92   :  { %v21_v5 = vpop.xlane.xlu0 %20 }
  0x93   :  { %v26_v6 = vmul.f32 0.0625, %v21_v5 }
  0x95   :  { %v28_v7 = vsub.f32 %v87_v1, %v26_v6 }
  0x96   :  { %v24_v8 = vpop.xlane.xlu0 %23 }
  0x97   :  { %v27_v9 = vmul.f32 0.0625, %v24_v8  ;;  %v30_v10 = vmul.f32 %v28_v7, %v28_v7 }
  0x99   :  { %v29_v11 = vsub.f32 %v88_v2, %v27_v9  ;;  %v32_v12 = vsel %vm18_vm0, %v30_v10, 0.0 }
  0x9a   :  { %33 = vadd.xlane.f32.xlu1 %v32_v12 }
  0x9b   :  { %v31_v13 = vmul.f32 %v29_v11, %v29_v11 }
  0x9d   :  { %v35_v14 = vsel %vm18_vm0, %v31_v13, 0.0 }
  0x9e   :  { %36 = vadd.xlane.f32.xlu1 %v35_v14 }
 0x127   :  { %v34_v15 = vpop.xlane.xlu1 %33 }
 0x128   :  { %v38_v16 = vmul.f32 0.0625, %v34_v15 }
 0x12a   :  { %v40_v17 = vadd.f32 1e-05, %v38_v16 }
 0x12b   :  { %v37_v18 = vpop.xlane.xlu1 %36 }
 0x12c   :  { %89 = vrsqrt.f32 %v40_v17  ;;  %v39_v19 = vmul.f32 0.0625, %v37_v18 }
 0x12e   :  { %v41_v20 = vadd.f32 1e-05, %v39_v19 }
 0x130   :  { %91 = vrsqrt.f32 %v41_v20 }
 0x136   :  { %v90_v21 = vpop.eup %89 }
 0x137   :  { %v44_v23 = vmul.f32 %v90_v21, %v28_v7 }
 0x139   :  { %v53_v25 = vmul.f32 %v79_v22, %v44_v23 }
 0x13a   :  { %v92_v26 = vpop.eup %91 }
 0x13b   :  { %v62_v27 = vadd.f32 %v80_v24, %v53_v25  ;;  %v45_v28 = vmul.f32 %v92_v26, %v29_v11 }
 0x13d   :  { %v83_v29 = vpack.c.bf16 %v62_v27, %v62_v27  ;;  %v54_v30 = vmul.f32 %v79_v22, %v45_v28 }
 0x13f   :  { %73 = vst.msk [vmem:[%s135_s3] sm:$0xf] %vm72_vm1, %v83_v29  ;;  %v63_v31 = vadd.f32 %v80_v24, %v54_v30 }
 0x141   :  { %v84_v32 = vpack.c.bf16 %v63_v31, %v63_v31 }
 0x143   :  { %74 = vst.msk [vmem:[%s135_s3 + $0x4] sm:$0xf] %vm72_vm1, %v84_v32 }

// kernel: _lambda_.48
= control target key start
LH: loop header
LB: loop body
LE: loop exit
PB: predicated region body
PF: predicated region fallthrough
CT: control target
= control target key end

     0   :  { %v214_v0 = vmov 0.0   ;;  %vm215_vm0 = vmmov 0   ;;  %s261_s1 = inlined_call_operand.vmem [shape: bf16[128,128], index: 1, kind: input, shape index: {}]   ;;  %s262_s0 = inlined_call_operand.vmem [shape: bf16[16,128], index: 0, kind: input, shape index: {}]   ;;  %s263_s2 = inlined_call_operand.vmem [shape: bf16[16,128], index: 2, kind: output, shape index: {}]  }
   0x1   :  { %183 = vmatprep.subr.bf16.mxu0 %v214_v0  ;;  %v205_v1 = vld [vmem:[%s261_s1] sm:$0xff]   ;;  %199 = vmatprep.mubr.msk.bf16.mxu0 %vm215_vm0, %v214_v0  ;;  %v206_v2 = vld [vmem:[%s261_s1 + $0x8] sm:$0xff]   ;;  %v207_v3 = vld [vmem:[%s261_s1 + $0x10] sm:$0xff]  }
   0x2   :  { %184 = vmatpush3.bf16.msra.mxu0 %v205_v1  ;;  %v208_v4 = vld [vmem:[%s261_s1 + $0x18] sm:$0xff]   ;;  %v209_v5 = vld [vmem:[%s261_s1 + $0x20] sm:$0xff]   ;;  %v210_v6 = vld [vmem:[%s261_s1 + $0x28] sm:$0xff]  }
   0x3   :  { %185 = vmatprep.subr.bf16.mxu0 %v214_v0  ;;  %v211_v7 = vld [vmem:[%s261_s1 + $0x30] sm:$0xff]   ;;  %v212_v8 = vld [vmem:[%s261_s1 + $0x38] sm:$0xff]   ;;  %v213_v9 = vld [vmem:[%s262_s0] sm:$0xff]  }
   0x6   :  { %186 = vmatpush3.bf16.msra.mxu0 %v206_v2 }
   0x7   :  { %187 = vmatprep.subr.bf16.mxu0 %v214_v0 }
   0xa   :  { %188 = vmatpush3.bf16.msra.mxu0 %v207_v3 }
   0xb   :  { %189 = vmatprep.subr.bf16.mxu0 %v214_v0 }
   0xe   :  { %190 = vmatpush3.bf16.msra.mxu0 %v208_v4 }
   0xf   :  { %191 = vmatprep.subr.bf16.mxu0 %v214_v0 }
  0x12   :  { %192 = vmatpush3.bf16.msra.mxu0 %v209_v5 }
  0x13   :  { %193 = vmatprep.subr.bf16.mxu0 %v214_v0 }
  0x16   :  { %194 = vmatpush3.bf16.msra.mxu0 %v210_v6 }
  0x17   :  { %195 = vmatprep.subr.bf16.mxu0 %v214_v0 }
  0x1a   :  { %196 = vmatpush3.bf16.msra.mxu0 %v211_v7 }
  0x1b   :  { %197 = vmatprep.subr.bf16.mxu0 %v214_v0 }
  0x1e   :  { %198 = vmatpush3.bf16.msra.mxu0 %v212_v8 }
  0x21   :  { %200 = vmatmul.mubr.bf16.vlgmr.msra.gmra.mrb[0].mxu0 %v213_v9 }
  0xf4   :  { %v126_v10 = vpop.f32.mrb[0].mxu0 }
  0xf5   :  { %v201_v11 = vpop.f32.mrb[1].mxu0 }
  0xf6   :  { %v129_v12 = vpop.f32.mrb[2].mxu0 }
  0xf7   :  { %v172_v13 = vpack.c.bf16 %v129_v12, %v126_v10  ;;  %v202_v14 = vpop.f32.mrb[3].mxu0 }
  0xf9   :  { %173 = vst [vmem:[%s263_s2] sm:$0xff] %v172_v13  }

// kernel: _lambda_.49
= control target key start
LH: loop header
LB: loop body
LE: loop exit
PB: predicated region body
PF: predicated region fallthrough
CT: control target
= control target key end

     0   :  { %s636_s12 = smov 0   ;;  %s638_s13 = smov 0   ;;  %s688_s0 = inlined_call_operand.vmem [shape: bf16[4,8,128], index: 0, kind: input, shape index: {}]   ;;  %s689_s1 = inlined_call_operand.vmem [shape: bf16[4,8,128], index: 1, kind: input, shape index: {}]   ;;  %s690_s2 = inlined_call_operand.vmem [shape: bf16[4,8,128], index: 2, kind: input, shape index: {}]   ;;  %s691_s3 = inlined_call_operand.vmem [shape: bf16[4,8,128], index: 3, kind: output, shape index: {}]  }
   0x1   :  { %s640_s14 = smov 0  }
   0x2 LB: > { %s32_s15 = sadd.s32 1, %s606_s13  ;;  %p528_p0 = scmp.ge.s32.totalorder %s610_s14, 1  ;;  %s610_s14 = sphi %s640_s14, %s13_s14   ;;  %s606_s13 = sphi %s638_s13, %s693_s13   ;;  %s602_s12 = sphi %s636_s12, %s692_s12  }
   0x3   : > { %p34_p1 = scmp.ge.s32.totalorder %s32_s15, 4  ;;  %p190_p2 = scmp.lt.s32.totalorder %s610_s14, 5 }
   0x5   : > { %s695_s15 = smov (%p34_p1, %s32_s15), 0  ;;  %p191_p3 = pnand %p528_p0, %p190_p2 }
   0x6   : > { %p232_p4 = scmp.lt.s32.totalorder (!%p191_p3), %s602_s12, 3  ;;  %v612_v0 = vmov (!%p191_p3), 0.0   ;;  %vm613_vm0 = vmmov (!%p191_p3), 0   ;;  %vm265_vm1 = vcmask (!%p191_p3), 7168   ;;  %v614_v3 = vmov (!%p191_p3), -inf  }
   0x7   : > { %194 = sbr.rel (%p191_p3) target bundleno = 825 (0x339), region = 32  ;;  %540 = vmatprep.subr.bf16.mxu0 (!%p191_p3), %v612_v0  ;;  %542 = vmatprep.mubr.msk.bf16.mxu0 (!%p191_p3), %vm613_vm0, %v612_v0  ;;  %266 = vst.msk [vmem:[#allocation2] sm:$0xff] (!%p191_p3), %vm265_vm1, %v614_v3  ;;  %267 = vst.msk [vmem:[#allocation3] sm:$0xff] (!%p191_p3), %vm265_vm1, %v612_v0  ;;  %v312_v4 = vlaneseq (!%p191_p3)  ;;  %vm320_vm3 = vcmask (!%p191_p3), 64512   ;;  %v615_v13 = vmov (!%p191_p3), 0   ;;  %vm356_vm4 = vcmask (!%p191_p3), 1043456  }
   0x8   : > { %546 = vmatprep.subr.bf16.mxu1 (!%p191_p3), %v612_v0  ;;  %548 = vmatprep.mubr.msk.bf16.mxu1 (!%p191_p3), %vm613_vm0, %v612_v0 }
   0x9   : > { %v313_v5 = vand.u32 (!%p191_p3), 127, %v312_v4  ;;  %580 = vset.pattern.permute.xlu0 (!%p191_p3), %v615_v13  ;;  %581 = vset.pattern.permute.xlu1 (!%p191_p3), %v615_v13 }
   0xb   : > { %vm317_vm2 = vcmp.lt.s32.totalorder (!%p191_p3), %v313_v5, 8 }
   0xe   : > { %s697_s12 = smov (!%p232_p4, %s602_s12), 3  ;;  %v319_v14 = vld [vmem:[#allocation2] sm:$0xff]  ;;  %v336_v28 = vld [vmem:[#allocation3] sm:$0xff] }
   0xf   : > { %s654_s16 = sshll.u32 %s697_s12, 2 }
  0x10   : > { %s245_s19 = scalar_lea.vmem %s689_s1, %s654_s16  ;;  %s238_s22 = scalar_lea.vmem %s688_s0, %s654_s16 }
  0x11   : > { %v270_v1 = vld [vmem:[%s245_s19] sm:$0xf]  ;;  %s252_s25 = scalar_lea.vmem %s690_s2, %s654_s16  ;;  %s259_s28 = scalar_lea.vmem %s691_s3, %s654_s16 }
  0x12   : > { %541 = vmatpush3.bf16.xpose.msra.mxu0 %v270_v1  ;;  %v269_v2 = vld [vmem:[%s238_s22] sm:$0xf] }
  0x13   : > { %v352_v18 = vld [vmem:[%s252_s25] sm:$0xf] }
  0x14   : > { %v358_v19 = vsel %vm356_vm4, %v352_v18, 0 }
  0x15   : > { %547 = vmatpush3.bf16.msra.mxu1 %v358_v19 }
  0x19   : > { %543 = vmatmul.mubr.bf16.vlgmr.msra.gmra.mrb[0].mxu0 %v269_v2 }
  0xec   : > { %v305_v6 = vpop.f32.mrb[0].mxu0 }
  0xed   : > { %v311_v7 = vmul.f32 0.35355338, %v305_v6  ;;  %v544_v8 = vpop.f32.mrb[1].mxu0 }
  0xee   : > { %v308_v9 = vpop.f32.mrb[2].mxu0 }
  0xef   : > { %v545_v10 = vpop.f32.mrb[3].mxu0  ;;  %v318_v11 = vsel %vm317_vm2, %v311_v7, -inf }
  0xf0   : > { %v321_v12 = vsel %vm320_vm3, %v318_v11, -inf }
  0xf1   : > { %322 = vmax.xlane.f32.xlu0 %v321_v12 }
 0x17e   : > { %v323_v15 = vpop.xlane.xlu0 %322 }
 0x17f   : > { %v324_v16 = vmax.f32 %v319_v14, %v323_v15 }
 0x181   : > { %v325_v17 = vsub.f32 %v319_v14, %v324_v16  ;;  %402 = vst.msk [vmem:[#allocation2] sm:$0xff] %vm265_vm1, %v324_v16  ;;  %330 = vperm.xlu0 %580, %v324_v16  }
 0x183   : > { %v326_v26 = vmul.f32 1.442695, %v325_v17 }
 0x200   : > { %v331_v20 = vpop.permute.xlu0 %330 }
 0x201   : > { %v333_v21 = vsub.f32 %v318_v11, %v331_v20 }
 0x203   : > { %v334_v22 = vmul.f32 1.442695, %v333_v21 }
 0x205   : > { %582 = vpow2.f32 %v334_v22 }
 0x206   : > { %584 = vpow2.f32 %v326_v26 }
 0x20f   : > { %v583_v23 = vpop.eup %582 }
 0x210   : > { %v338_v24 = vsel %vm320_vm3, %v583_v23, 0.0  ;;  %v351_v25 = vpack.c.bf16 %v583_v23, %v583_v23  ;;  %v585_v27 = vpop.eup %584 }
 0x211   : > { %339 = vadd.xlane.f32.xlu1 %v338_v24  ;;  %v337_v29 = vmul.f32 %v585_v27, %v336_v28 }
 0x212   : > { %549 = vmatmul.mubr.msk.bf16.vlgmr.msra.gmra.mrb[0].mxu1 %vm320_vm3, %v351_v25 }
 0x222   : > { %347 = vperm.xlu1 %581, %v585_v27  }
 0x29e   : > { %v340_v30 = vpop.xlane.xlu1 %339 }
 0x29f   : > { %v341_v31 = vadd.f32 %v340_v30, %v337_v29 }
 0x2a1   : > { %343 = vst.msk [vmem:[#allocation3] sm:$0xff] %vm265_vm1, %v341_v31 }
 0x2a2   : > { %v348_v38 = vpop.permute.xlu1 %347 }
 0x2a3   : > { %v350_v39 = vmul.f32 0.0, %v348_v38 }
 0x2a8   : > { %v407_v32 = vld [vmem:[#allocation3] sm:$0xff] }
 0x2a9   : > { %586 = vrcp.f32 %v407_v32 }
 0x2b3   : > { %v587_v33 = vpop.eup %586 }
 0x2b4   : > { %411 = vperm.xlu1 %581, %v587_v33  }
 0x2e5   : > { %v394_v34 = vpop.f32.mrb[0].mxu1 }
 0x2e6   : > { %v550_v35 = vpop.f32.mrb[1].mxu1  ;;  %v400_v40 = vadd.f32 %v394_v34, %v350_v39 }
 0x2e7   : > { %v397_v36 = vpop.f32.mrb[2].mxu1 }
 0x2e8   : > { %v551_v37 = vpop.f32.mrb[3].mxu1 }
 0x333   : > { %v412_v41 = vpop.permute.xlu1 %411 }
 0x334   : > { %v414_v42 = vmul.f32 %v412_v41, %v400_v40 }
 0x336   : > { %v415_v43 = vpack.c.bf16 %v414_v42, %v414_v42 }
 0x338   : > { %416 = vst [vmem:[%s259_s28] sm:$0xf] %v415_v43 }
 0x339 PF: > { %s13_s14 = sadd.s32 1, %s610_s14   ;;  %s692_s12 = smov %s606_s13 }
 0x33a   : > { %p10_p5 = scmp.ge.s32.totalorder %s13_s14, 6   ;;  %s693_s13 = smov %s695_s15 }
 0x33c   :  { %12 = sbr.rel (!%p10_p5) target bundleno = 2 (0x2), region = 76 }

// kernel: _lambda_.50
= control target key start
LH: loop header
LB: loop body
LE: loop exit
PB: predicated region body
PF: predicated region fallthrough
CT: control target
= control target key end

     0   :  { %v227_v0 = vmov 0.0   ;;  %vm228_vm0 = vmmov 0   ;;  %s282_s1 = inlined_call_operand.vmem [shape: bf16[128,128], index: 1, kind: input, shape index: {}]   ;;  %s283_s0 = inlined_call_operand.vmem [shape: bf16[16,128], index: 0, kind: input, shape index: {}]   ;;  %s284_s2 = inlined_call_operand.vmem [shape: f32[1,128], index: 2, kind: input, shape index: {}]   ;;  %s285_s3 = inlined_call_operand.vmem [shape: bf16[16,128], index: 3, kind: output, shape index: {}]  }
   0x1   :  { %196 = vmatprep.subr.bf16.mxu0 %v227_v0  ;;  %v218_v1 = vld [vmem:[%s282_s1] sm:$0xff]   ;;  %212 = vmatprep.mubr.msk.bf16.mxu0 %vm228_vm0, %v227_v0  ;;  %v219_v2 = vld [vmem:[%s282_s1 + $0x8] sm:$0xff]   ;;  %v220_v3 = vld [vmem:[%s282_s1 + $0x10] sm:$0xff]  }
   0x2   :  { %197 = vmatpush3.bf16.msra.mxu0 %v218_v1  ;;  %v221_v4 = vld [vmem:[%s282_s1 + $0x18] sm:$0xff]   ;;  %v222_v5 = vld [vmem:[%s282_s1 + $0x20] sm:$0xff]   ;;  %v223_v6 = vld [vmem:[%s282_s1 + $0x28] sm:$0xff]  }
   0x3   :  { %198 = vmatprep.subr.bf16.mxu0 %v227_v0  ;;  %v224_v7 = vld [vmem:[%s282_s1 + $0x30] sm:$0xff]   ;;  %v225_v8 = vld [vmem:[%s282_s1 + $0x38] sm:$0xff]   ;;  %v226_v9 = vld [vmem:[%s283_s0] sm:$0xff]  }
   0x4   :  { %v177_v11 = vld [vmem:[%s284_s2] ss:$0 sm:$0xff] }
   0x6   :  { %199 = vmatpush3.bf16.msra.mxu0 %v219_v2 }
   0x7   :  { %200 = vmatprep.subr.bf16.mxu0 %v227_v0 }
   0xa   :  { %201 = vmatpush3.bf16.msra.mxu0 %v220_v3 }
   0xb   :  { %202 = vmatprep.subr.bf16.mxu0 %v227_v0 }
   0xe   :  { %203 = vmatpush3.bf16.msra.mxu0 %v221_v4 }
   0xf   :  { %204 = vmatprep.subr.bf16.mxu0 %v227_v0 }
  0x12   :  { %205 = vmatpush3.bf16.msra.mxu0 %v222_v5 }
  0x13   :  { %206 = vmatprep.subr.bf16.mxu0 %v227_v0 }
  0x16   :  { %207 = vmatpush3.bf16.msra.mxu0 %v223_v6 }
  0x17   :  { %208 = vmatprep.subr.bf16.mxu0 %v227_v0 }
  0x1a   :  { %209 = vmatpush3.bf16.msra.mxu0 %v224_v7 }
  0x1b   :  { %210 = vmatprep.subr.bf16.mxu0 %v227_v0 }
  0x1e   :  { %211 = vmatpush3.bf16.msra.mxu0 %v225_v8 }
  0x21   :  { %213 = vmatmul.mubr.bf16.vlgmr.msra.gmra.mrb[0].mxu0 %v226_v9 }
  0xf4   :  { %v129_v10 = vpop.f32.mrb[0].mxu0 }
  0xf5   :  { %v214_v12 = vpop.f32.mrb[1].mxu0  ;;  %v152_v14 = vadd.f32 %v177_v11, %v129_v10 }
  0xf6   :  { %v132_v13 = vpop.f32.mrb[2].mxu0 }
  0xf7   :  { %v153_v15 = vadd.f32 %v177_v11, %v132_v13  ;;  %v215_v16 = vpop.f32.mrb[3].mxu0 }
  0xf9   :  { %v185_v17 = vpack.c.bf16 %v153_v15, %v152_v14 }
  0xfb   :  { %186 = vst [vmem:[%s285_s3] sm:$0xff] %v185_v17  }

// kernel: _lambda_.54
= control target key start
LH: loop header
LB: loop body
LE: loop exit
PB: predicated region body
PF: predicated region fallthrough
CT: control target
= control target key end

     0   :  { %vm16_vm0 = vcmask 130048   ;;  %vm48_vm1 = vcmask 125952   ;;  %s90_s0 = inlined_call_operand.vmem [shape: bf16[8,16], index: 0, kind: input, shape index: {}]   ;;  %s91_s1 = inlined_call_operand.vmem [shape: f32[1,16], index: 1, kind: input, shape index: {}]   ;;  %s92_s2 = inlined_call_operand.vmem [shape: f32[1,16], index: 2, kind: input, shape index: {}]   ;;  %s93_s3 = inlined_call_operand.vmem [shape: bf16[8,16], index: 3, kind: output, shape index: {}]  }
   0x1   :  { %v14_v0 = vld [vmem:[%s90_s0] sm:$0xf] }
   0x2   :  { %v15_v1 = vunpack.c.l.bf16 %v14_v0  ;;  %v54_v12 = vld [vmem:[%s91_s1] ss:$0 sm:$0xff] }
   0x3   :  { %v55_v14 = vld [vmem:[%s92_s2] ss:$0 sm:$0xff] }
   0x4   :  { %v17_v2 = vsel %vm16_vm0, %v15_v1, 0.0 }
   0x5   :  { %18 = vadd.xlane.f32.xlu0 %v17_v2 }
  0x92   :  { %v19_v3 = vpop.xlane.xlu0 %18 }
  0x93   :  { %v21_v4 = vmul.f32 0.0625, %v19_v3 }
  0x95   :  { %v22_v5 = vsub.f32 %v15_v1, %v21_v4 }
  0x97   :  { %v23_v6 = vmul.f32 %v22_v5, %v22_v5 }
  0x99   :  { %v24_v7 = vsel %vm16_vm0, %v23_v6, 0.0 }
  0x9a   :  { %25 = vadd.xlane.f32.xlu0 %v24_v7 }
 0x127   :  { %v26_v8 = vpop.xlane.xlu0 %25 }
 0x128   :  { %v27_v9 = vmul.f32 0.0625, %v26_v8 }
 0x12a   :  { %v28_v10 = vadd.f32 1e-05, %v27_v9 }
 0x12c   :  { %56 = vrsqrt.f32 %v28_v10 }
 0x136   :  { %v57_v11 = vpop.eup %56 }
 0x137   :  { %v30_v13 = vmul.f32 %v57_v11, %v22_v5 }
 0x139   :  { %v38_v15 = vmul.f32 %v54_v12, %v30_v13 }
 0x13b   :  { %v46_v16 = vadd.f32 %v55_v14, %v38_v15 }
 0x13d   :  { %v47_v17 = vpack.c.bf16 %v46_v16, %v46_v16 }
 0x13f   :  { %49 = vst.msk [vmem:[%s93_s3] sm:$0xf] %vm48_vm1, %v47_v17 }

// kernel: _lambda_.55
= control target key start
LH: loop header
LB: loop body
LE: loop exit
PB: predicated region body
PF: predicated region fallthrough
CT: control target
= control target key end

     0   :  { %s752_s12 = smov 0   ;;  %s754_s13 = smov 0   ;;  %s842_s0 = inlined_call_operand.vmem [shape: bf16[8,128], index: 0, kind: input, shape index: {}]   ;;  %s843_s1 = inlined_call_operand.vmem [shape: bf16[128,384], index: 1, kind: input, shape index: {}]   ;;  %s844_s2 = inlined_call_operand.vmem [shape: f32[1,384], index: 2, kind: input, shape index: {}]   ;;  %s845_s3 = inlined_call_operand.vmem [shape: f32[8,384], index: 3, kind: output, shape index: {}]  }
   0x1   :  { %s756_s14 = smov 0   ;;  %s758_s15 = smov 0  }
   0x2   :  { %s760_s16 = smov 0  }
   0x3 LB: > { %s28_s17 = sadd.s32 1, %s724_s15  ;;  %p76_p1 = scmp.ne.s32.totalorder %s716_s13, %s712_s12  ;;  %s728_s16 = sphi %s760_s16, %s13_s16   ;;  %s724_s15 = sphi %s758_s15, %s849_s15   ;;  %s720_s14 = sphi %s756_s14, %s848_s14   ;;  %s716_s13 = sphi %s754_s13, %s847_s13   ;;  %s712_s12 = sphi %s752_s12, %s846_s12  }
   0x4   : > { %p30_p0 = scmp.ge.s32.totalorder %s28_s17, 3  ;;  %p77_p2 = scmp.eq.s32.totalorder %s728_s16, 0 }
   0x5   : > { %s69_s19 = sadd.s32 1, %s716_s13  ;;  %p594_p5 = scmp.ge.s32.totalorder %s728_s16, 3 }
   0x6   : > { %s851_s17 = smov (%p30_p0, %s28_s17), 0  ;;  %p78_p3 = por %p77_p2, %p76_p1 }
   0x7   : > { %s65_s18 = ssub.s32 %s724_s15, %s851_s17  ;;  %166 = sbr.rel (%p594_p5) target bundleno = 28 (0x1c), region = 20 }
   0x8   : > { %p67_p4 = scmp.eq.s32.totalorder %s65_s18, 0 }
   0xa   : > { %s787_s20 = scalar_select %p67_p4, %s716_s13, %s69_s19  }
   0xe   : > { %169 = sbr.rel (!%p78_p3) target bundleno = 28 (0x1c), region = 24  ;;  %s171_s21 = sand.u32 (%p78_p3), 1, %s716_s13  }
   0xf   : > { %s596_s22 = sshll.u32 (%p78_p3), %s724_s15, 2  ;;  %s595_s23 = sshll.u32 (%p78_p3), %s171_s21, 6 }
  0x10   : > { %s795_s26 = scalar_lea.vmem (%p78_p3), %s843_s1, %s596_s22  ;;  %s173_s27 = scalar_lea.vmem (%p78_p3), [#allocation3], %s595_s23 }
  0x11   : > { %v194_v0 = vld [vmem:[%s795_s26] sm:$0xf] (%p78_p3)  ;;  %v196_v1 = vld [vmem:[%s795_s26 + $0xc] sm:$0xf] (%p78_p3)  ;;  %v198_v2 = vld [vmem:[%s795_s26 + $0x18] sm:$0xf] (%p78_p3) }
  0x12   : > { %195 = vst [vmem:[%s173_s27] sm:$0xf] (%p78_p3), %v194_v0  ;;  %197 = vst [vmem:[%s173_s27 + $0x4] sm:$0xf] (%p78_p3), %v196_v1  ;;  %v200_v3 = vld [vmem:[%s795_s26 + $0x24] sm:$0xf] (%p78_p3) }
  0x13   : > { %v202_v4 = vld [vmem:[%s795_s26 + $0x30] sm:$0xf] (%p78_p3)  ;;  %199 = vst [vmem:[%s173_s27 + $0x8] sm:$0xf] (%p78_p3), %v198_v2  ;;  %201 = vst [vmem:[%s173_s27 + $0xc] sm:$0xf] (%p78_p3), %v200_v3 }
  0x14   : > { %203 = vst [vmem:[%s173_s27 + $0x10] sm:$0xf] (%p78_p3), %v202_v4  ;;  %v204_v5 = vld [vmem:[%s795_s26 + $0x3c] sm:$0xf] (%p78_p3)  ;;  %v206_v6 = vld [vmem:[%s795_s26 + $0x48] sm:$0xf] (%p78_p3) }
  0x15   : > { %v208_v7 = vld [vmem:[%s795_s26 + $0x54] sm:$0xf]  ;;  %205 = vst [vmem:[%s173_s27 + $0x14] sm:$0xf] %v204_v5  ;;  %207 = vst [vmem:[%s173_s27 + $0x18] sm:$0xf] %v206_v6 }
  0x16   : > { %209 = vst [vmem:[%s173_s27 + $0x1c] sm:$0xf] %v208_v7  ;;  %v210_v8 = vld [vmem:[%s795_s26 + $0x60] sm:$0xf]  ;;  %v212_v9 = vld [vmem:[%s795_s26 + $0x6c] sm:$0xf] }
  0x17   : > { %v214_v10 = vld [vmem:[%s795_s26 + $0x78] sm:$0xf]  ;;  %211 = vst [vmem:[%s173_s27 + $0x20] sm:$0xf] %v210_v8  ;;  %213 = vst [vmem:[%s173_s27 + $0x24] sm:$0xf] %v212_v9 }
  0x18   : > { %215 = vst [vmem:[%s173_s27 + $0x28] sm:$0xf] %v214_v10  ;;  %v216_v11 = vld [vmem:[%s795_s26 + $0x84] sm:$0xf]  ;;  %v218_v12 = vld [vmem:[%s795_s26 + $0x90] sm:$0xf] }
  0x19   : > { %v220_v13 = vld [vmem:[%s795_s26 + $0x9c] sm:$0xf]  ;;  %217 = vst [vmem:[%s173_s27 + $0x2c] sm:$0xf] %v216_v11  ;;  %219 = vst [vmem:[%s173_s27 + $0x30] sm:$0xf] %v218_v12 }
  0x1a   : > { %221 = vst [vmem:[%s173_s27 + $0x34] sm:$0xf] %v220_v13  ;;  %v222_v14 = vld [vmem:[%s795_s26 + $0xa8] sm:$0xf]  ;;  %v224_v15 = vld [vmem:[%s795_s26 + $0xb4] sm:$0xf] }
  0x1b   : > { %223 = vst [vmem:[%s173_s27 + $0x38] sm:$0xf] %v222_v14  ;;  %225 = vst [vmem:[%s173_s27 + $0x3c] sm:$0xf] %v224_v15 }
  0x1c PF: > { %p597_p6 = scmp.ge.s32.totalorder %s728_s16, 1  ;;  %p285_p7 = scmp.lt.s32.totalorder %s728_s16, 4 }
  0x1e   : > { %p286_p8 = pnand %p597_p6, %p285_p7 }
  0x1f   : > { %s292_s28 = sand.u32 (!%p286_p8), 1, %s712_s12   ;;  %v730_v16 = vmov (!%p286_p8), 0.0   ;;  %vm731_vm0 = vmmov (!%p286_p8), 0   ;;  %v354_v25 = vld [vmem:[%s842_s0] sm:$0xf] (!%p286_p8)  ;;  %p336_p9 = scmp.lt.s32.totalorder (!%p286_p8), %s720_s14, 2 }
  0x20   : > { %289 = sbr.rel (%p286_p8) target bundleno = 281 (0x119), region = 69  ;;  %620 = vmatprep.subr.bf16.mxu0 (!%p286_p8), %v730_v16  ;;  %s598_s29 = sshll.u32 (!%p286_p8), %s292_s28, 6  ;;  %636 = vmatprep.mubr.msk.bf16.mxu0 (!%p286_p8), %vm731_vm0, %v730_v16 }
  0x21   : > { %s294_s30 = scalar_lea.vmem (!%p286_p8), [#allocation3], %s598_s29 }
  0x22   : > { %v682_v17 = vld [vmem:[%s294_s30] sm:$0xff] (!%p286_p8)   ;;  %v683_v18 = vld [vmem:[%s294_s30 + $0x8] sm:$0xff] (!%p286_p8)   ;;  %v684_v19 = vld [vmem:[%s294_s30 + $0x10] sm:$0xff] (!%p286_p8)  }
  0x23   : > { %621 = vmatpush3.bf16.msra.mxu0 (!%p286_p8), %v682_v17  ;;  %v685_v20 = vld [vmem:[%s294_s30 + $0x18] sm:$0xff] (!%p286_p8)   ;;  %v686_v21 = vld [vmem:[%s294_s30 + $0x20] sm:$0xff] (!%p286_p8)   ;;  %v687_v22 = vld [vmem:[%s294_s30 + $0x28] sm:$0xff] (!%p286_p8)  }
  0x24   : > { %622 = vmatprep.subr.bf16.mxu0 (!%p286_p8), %v730_v16  ;;  %v688_v23 = vld [vmem:[%s294_s30 + $0x30] sm:$0xff] (!%p286_p8)   ;;  %v689_v24 = vld [vmem:[%s294_s30 + $0x38] sm:$0xff] (!%p286_p8)  }
  0x27   : > { %623 = vmatpush3.bf16.msra.mxu0 %v683_v18  ;;  %s853_s14 = smov (!%p336_p9, %s720_s14), 2 }
  0x28   : > { %624 = vmatprep.subr.bf16.mxu0 %v730_v16  ;;  %s338_s8 = scalar_lea.vmem %s844_s2, %s853_s14  ;;  %s599_s9 = sshll.u32 %s853_s14, 3 }
  0x29   : > { %v608_v26 = vld [vmem:[%s338_s8] ss:$0 sm:$0xff]  ;;  %s346_s12 = scalar_lea.vmem %s845_s3, %s599_s9 }
  0x2b   : > { %625 = vmatpush3.bf16.msra.mxu0 %v684_v19 }
  0x2c   : > { %626 = vmatprep.subr.bf16.mxu0 %v730_v16 }
  0x2f   : > { %627 = vmatpush3.bf16.msra.mxu0 %v685_v20 }
  0x30   : > { %628 = vmatprep.subr.bf16.mxu0 %v730_v16 }
  0x33   : > { %629 = vmatpush3.bf16.msra.mxu0 %v686_v21 }
  0x34   : > { %630 = vmatprep.subr.bf16.mxu0 %v730_v16 }
  0x37   : > { %631 = vmatpush3.bf16.msra.mxu0 %v687_v22 }
  0x38   : > { %632 = vmatprep.subr.bf16.mxu0 %v730_v16 }
  0x3b   : > { %633 = vmatpush3.bf16.msra.mxu0 %v688_v23 }
  0x3c   : > { %634 = vmatprep.subr.bf16.mxu0 %v730_v16 }
  0x3f   : > { %635 = vmatpush3.bf16.msra.mxu0 %v689_v24 }
  0x42   : > { %637 = vmatmul.mubr.bf16.vlgmr.msra.gmra.mrb[0].mxu0 %v354_v25 }
 0x115   : > { %v453_v27 = vpop.f32.mrb[0].mxu0 }
 0x116   : > { %v472_v28 = vadd.f32 %v608_v26, %v453_v27  ;;  %v638_v29 = vpop.f32.mrb[1].mxu0 }
 0x117   : > { %v456_v30 = vpop.f32.mrb[2].mxu0 }
 0x118   : > { %473 = vst [vmem:[%s346_s12] sm:$0xff] %v472_v28  ;;  %v639_v31 = vpop.f32.mrb[3].mxu0 }
 0x119 PF: > { %s13_s16 = sadd.s32 1, %s728_s16   ;;  %s846_s12 = smov %s716_s13 }
 0x11a   : > { %p10_p10 = scmp.ge.s32.totalorder %s13_s16, 5   ;;  %s847_s13 = smov %s787_s20 }
 0x11b   : > { %s848_s14 = smov %s724_s15  ;;  %s849_s15 = smov %s851_s17 }
 0x11c   :  { %12 = sbr.rel (!%p10_p10) target bundleno = 3 (0x3), region = 122 }

// kernel: _lambda_.44
= control target key start
LH: loop header
LB: loop body
LE: loop exit
PB: predicated region body
PF: predicated region fallthrough
CT: control target
= control target key end

     0   :  { %vm15_vm0 = vcmask 261120   ;;  %vm47_vm1 = vcmask 257024   ;;  %s89_s0 = inlined_call_operand.vmem [shape: f32[8,32], index: 0, kind: input, shape index: {}]   ;;  %s90_s1 = inlined_call_operand.vmem [shape: f32[1,32], index: 1, kind: input, shape index: {}]   ;;  %s91_s2 = inlined_call_operand.vmem [shape: f32[1,32], index: 2, kind: input, shape index: {}]   ;;  %s92_s3 = inlined_call_operand.vmem [shape: bf16[8,32], index: 3, kind: output, shape index: {}]  }
   0x1   :  { %v14_v0 = vld [vmem:[%s89_s0] sm:$0xff] }
   0x2   :  { %v16_v1 = vsel %vm15_vm0, %v14_v0, 0.0  ;;  %v53_v11 = vld [vmem:[%s90_s1] ss:$0 sm:$0xff] }
   0x3   :  { %17 = vadd.xlane.f32.xlu0 %v16_v1  ;;  %v54_v13 = vld [vmem:[%s91_s2] ss:$0 sm:$0xff] }
  0x90   :  { %v18_v2 = vpop.xlane.xlu0 %17 }
  0x91   :  { %v20_v3 = vmul.f32 0.03125, %v18_v2 }
  0x93   :  { %v21_v4 = vsub.f32 %v14_v0, %v20_v3 }
  0x95   :  { %v22_v5 = vmul.f32 %v21_v4, %v21_v4 }
  0x97   :  { %v23_v6 = vsel %vm15_vm0, %v22_v5, 0.0 }
  0x98   :  { %24 = vadd.xlane.f32.xlu0 %v23_v6 }
 0x125   :  { %v25_v7 = vpop.xlane.xlu0 %24 }
 0x126   :  { %v26_v8 = vmul.f32 0.03125, %v25_v7 }
 0x128   :  { %v27_v9 = vadd.f32 1e-05, %v26_v8 }
 0x12a   :  { %55 = vrsqrt.f32 %v27_v9 }
 0x134   :  { %v56_v10 = vpop.eup %55 }
 0x135   :  { %v29_v12 = vmul.f32 %v56_v10, %v21_v4 }
 0x137   :  { %v37_v14 = vmul.f32 %v53_v11, %v29_v12 }
 0x139   :  { %v45_v15 = vadd.f32 %v54_v13, %v37_v14 }
 0x13b   :  { %v46_v16 = vpack.c.bf16 %v45_v15, %v45_v15 }
 0x13d   :  { %48 = vst.msk [vmem:[%s92_s3] sm:$0xf] %vm47_vm1, %v46_v16 }

// kernel: _lambda_.45
= control target key start
LH: loop header
LB: loop body
LE: loop exit
PB: predicated region body
PF: predicated region fallthrough
CT: control target
= control target key end

     0   :  { %v193_v0 = vmov 0.0   ;;  %vm194_vm0 = vmmov 0   ;;  %s248_s1 = inlined_call_operand.vmem [shape: bf16[128,128], index: 1, kind: input, shape index: {}]   ;;  %s249_s0 = inlined_call_operand.vmem [shape: bf16[8,128], index: 0, kind: input, shape index: {}]   ;;  %s250_s2 = inlined_call_operand.vmem [shape: f32[1,128], index: 2, kind: input, shape index: {}]   ;;  %s251_s3 = inlined_call_operand.vmem [shape: f32[8,128], index: 3, kind: output, shape index: {}]  }
   0x1   :  { %163 = vmatprep.subr.bf16.mxu0 %v193_v0  ;;  %v185_v1 = vld [vmem:[%s248_s1] sm:$0xff]   ;;  %179 = vmatprep.mubr.msk.bf16.mxu0 %vm194_vm0, %v193_v0  ;;  %v186_v2 = vld [vmem:[%s248_s1 + $0x8] sm:$0xff]   ;;  %v187_v3 = vld [vmem:[%s248_s1 + $0x10] sm:$0xff]  }
   0x2   :  { %164 = vmatpush3.bf16.msra.mxu0 %v185_v1  ;;  %v188_v4 = vld [vmem:[%s248_s1 + $0x18] sm:$0xff]   ;;  %v189_v5 = vld [vmem:[%s248_s1 + $0x20] sm:$0xff]   ;;  %v190_v6 = vld [vmem:[%s248_s1 + $0x28] sm:$0xff]  }
   0x3   :  { %165 = vmatprep.subr.bf16.mxu0 %v193_v0  ;;  %v191_v7 = vld [vmem:[%s248_s1 + $0x30] sm:$0xff]   ;;  %v192_v8 = vld [vmem:[%s248_s1 + $0x38] sm:$0xff]   ;;  %v21_v9 = vld [vmem:[%s249_s0] sm:$0xf] }
   0x4   :  { %v153_v10 = vld [vmem:[%s250_s2] ss:$0 sm:$0xff] }
   0x6   :  { %166 = vmatpush3.bf16.msra.mxu0 %v186_v2 }
   0x7   :  { %167 = vmatprep.subr.bf16.mxu0 %v193_v0 }
   0xa   :  { %168 = vmatpush3.bf16.msra.mxu0 %v187_v3 }
   0xb   :  { %169 = vmatprep.subr.bf16.mxu0 %v193_v0 }
   0xe   :  { %170 = vmatpush3.bf16.msra.mxu0 %v188_v4 }
   0xf   :  { %171 = vmatprep.subr.bf16.mxu0 %v193_v0 }
  0x12   :  { %172 = vmatpush3.bf16.msra.mxu0 %v189_v5 }
  0x13   :  { %173 = vmatprep.subr.bf16.mxu0 %v193_v0 }
  0x16   :  { %174 = vmatpush3.bf16.msra.mxu0 %v190_v6 }
  0x17   :  { %175 = vmatprep.subr.bf16.mxu0 %v193_v0 }
  0x1a   :  { %176 = vmatpush3.bf16.msra.mxu0 %v191_v7 }
  0x1b   :  { %177 = vmatprep.subr.bf16.mxu0 %v193_v0 }
  0x1e   :  { %178 = vmatpush3.bf16.msra.mxu0 %v192_v8 }
  0x21   :  { %180 = vmatmul.mubr.bf16.vlgmr.msra.gmra.mrb[0].mxu0 %v21_v9 }
  0xf4   :  { %v120_v11 = vpop.f32.mrb[0].mxu0 }
  0xf5   :  { %v139_v12 = vadd.f32 %v153_v10, %v120_v11  ;;  %v181_v13 = vpop.f32.mrb[1].mxu0 }
  0xf6   :  { %v123_v14 = vpop.f32.mrb[2].mxu0 }
  0xf7   :  { %140 = vst [vmem:[%s251_s3] sm:$0xff] %v139_v12  ;;  %v182_v15 = vpop.f32.mrb[3].mxu0 }

</bundles_post_ra>
